<compile_context>
chip_gen: v7x
topology: tpu7x:2x2x1
jax: 0.10.0
libtpu: 0.0.40
codegen_flags: <defaults>
</compile_context>

<pallas_src>
import functools

import jax
import jax.numpy as jnp
from jax import lax
from jax.experimental import pallas as pl
from jax.experimental.pallas import tpu as pltpu


def lstm_var_len_kernel(x_ref, len_ref,
                        wih_ref, whh_ref, b_ref,
                        w1_ref, b1_ref, w2_ref, b2_ref,
                        out_ref,
                        gx_scr, hout_scr, h_scr, c_scr,
                        *, t_tile, bt, hidden):
    """One (batch tile, time tile) of the LSTM + both Linear layers.

    x_ref    : (t_tile, bt, C_in)       streamed input tile (time-major)
    len_ref  : (bt, 1) int32            sequence lengths (padded batch rows = 0)
    wih_ref  : (C_in, G) bf16           input->gate weights, gates densely packed [i,f,o,g]
    whh_ref  : (H, G) bf16              hidden->gate weights, same packing
    b_ref    : (1, G) f32               bias_ih + bias_hh, same packing
    w1_ref   : (H, H1p) bf16,  b1_ref : (1, H1p) f32
    w2_ref   : (H1p, Cp) bf16, b2_ref : (1, Cp) f32
    out_ref  : (t_tile, bt, Cp) f32     lane-dense output tile
    gx_scr   : (t_tile*bt, G) f32       pre-computed input-gate activations
    hout_scr : (t_tile*bt, H) f32       masked hidden states for this tile
    h_scr, c_scr : (bt, H) f32          recurrent state (persists across time tiles)
    """
    H = hidden
    t_idx = pl.program_id(1)

    # Init persistent recurrent state at the first time tile of each batch tile.
    @pl.when(t_idx == 0)
    def _():
        h_scr[...] = jnp.zeros_like(h_scr)
        c_scr[...] = jnp.zeros_like(c_scr)

    rows = t_tile * bt
    c_in = x_ref.shape[-1]

    # (1) Batched input projection for the whole tile: one MXU matmul, off the
    #     serial critical path; bias folded in.
    x_tile = x_ref[...].reshape(rows, c_in)
    gx_scr[...] = (
        jnp.dot(x_tile.astype(jnp.bfloat16), wih_ref[...],
                preferred_element_type=jnp.float32)
        + b_ref[...])

    lens = len_ref[...]                  # (bt, 1) int32, loop invariant
    t_base = t_idx * t_tile

    # (2) Serial recurrence.  h/c carried in vregs; W_hh streams from VMEM each
    #     step (no long-lived vreg hoist -> low register pressure).
    def step(t, carry):
        h, c = carry
        row = t * bt
        if not isinstance(t, int):       # dynamic (fori_loop) index: alignment hint
            row = pl.multiple_of(row, bt)

        gates = gx_scr[pl.ds(row, bt), :] + jnp.dot(
            h.astype(jnp.bfloat16), whh_ref[...],
            preferred_element_type=jnp.float32)

        # Densely packed gate order [i, f, o, g], each H lanes wide: one sigmoid
        # over the contiguous [0, 3H) block, one tanh over [3H, 4H).
        sig = jax.nn.sigmoid(gates[:, 0:3 * H])
        i_g = sig[:, 0 * H:1 * H]
        f_g = sig[:, 1 * H:2 * H]
        o_g = sig[:, 2 * H:3 * H]
        g_g = jnp.tanh(gates[:, 3 * H:4 * H])

        c_new = f_g * c + i_g * g_g
        h_new = o_g * jnp.tanh(c_new)

        valid = (t_base + t) < lens      # (bt, 1) bool

        # packed-sequence semantics: freeze state past each sequence's length;
        # pad_packed_sequence zero-fills padded positions of the LSTM output.
        h_next = jnp.where(valid, h_new, h)
        c_next = jnp.where(valid, c_new, c)
        hout_scr[pl.ds(row, bt), :] = jnp.where(valid, h_new, 0.0)
        return h_next, c_next

    carry0 = (h_scr[...], c_scr[...])
    if t_tile <= 8:
        h_fin, c_fin = carry0
        for t in range(t_tile):          # full static unroll (LLO visibility)
            h_fin, c_fin = step(t, (h_fin, c_fin))
    else:
        h_fin, c_fin = lax.fori_loop(0, t_tile, step, carry0, unroll=8)
    # Write recurrent state back ONCE per tile.
    h_scr[...] = h_fin
    c_scr[...] = c_fin

    # (3) linear1 -> linear2, batched over the whole tile, lane-dense output store.
    y1 = (jnp.dot(hout_scr[...].astype(jnp.bfloat16), w1_ref[...],
                  preferred_element_type=jnp.float32) + b1_ref[...])
    y2 = (jnp.dot(y1.astype(jnp.bfloat16), w2_ref[...],
                  preferred_element_type=jnp.float32) + b2_ref[...])
    out_ref[...] = y2.reshape(t_tile, bt, out_ref.shape[-1])


def _round_up(n, m):
    return ((n + m - 1) // m) * m


def _pack_gates(w_t, h, g_cols):
    """w_t: (rows, 4h) with torch gate order [i, f, g, o] along columns.
    Returns (rows, g_cols) with gates densely packed in order [i, f, o, g]
    (zero padding only on the right of the last gate)."""
    i_, f_, gg, o_ = (w_t[:, k * h:(k + 1) * h] for k in range(4))
    packed = jnp.concatenate([i_, f_, o_, gg], axis=1)
    return jnp.pad(packed, ((0, 0), (0, g_cols - 4 * h)))


def _pad2(w, r, c):
    return jnp.pad(w, ((0, r - w.shape[0]), (0, c - w.shape[1])))


def lstm_variable_length_forward(x, lengths, params, *, t_tile=32):
    """x: (B, T, C_in) float32, lengths: python list / 1-D sequence of length B."""
    x = jnp.asarray(x, jnp.float32)
    B, T, C_in = x.shape
    wih, whh, bih, bhh, w1, b1, w2, b2 = (params[k] for k in
                                          ("w_ih", "w_hh", "b_ih", "b_hh",
                                           "w1", "b1", "w2", "b2"))
    H = whh.shape[1]            # torch (4H, H)
    H1 = w1.shape[0]            # torch (H1, H)
    C_out = w2.shape[0]         # torch (C_out, H1)

    f32 = jnp.float32
    mxu_dtype = jnp.bfloat16    # MXU operands; accumulation / state math stays f32
                                # (bf16 cast of h each step: re-validate for very long T)

    # Host-side lengths (pack_padded_sequence also requires CPU lengths) -> no device sync.
    lens_host = [int(v) for v in list(lengths)]
    t_max = max(lens_host)
    assert 1 <= t_max <= T

    bt = min(_round_up(B, 8), 128)       # batch tile (sublane multiple, <=128 MXU rows)
    Bp = _round_up(B, bt)
    n_b = Bp // bt
    G = _round_up(4 * H, 128)            # densely packed gate lanes
    H1p = _round_up(H1, 128)
    Cp = _round_up(C_out, 128)           # lane-dense output stores

    # Grid covers only max(lengths): tiles past the longest sequence are skipped.
    t_tile = max(1, min(t_tile, t_max))
    Tp = _round_up(t_max, t_tile)
    n_t = Tp // t_tile
    rows = t_tile * bt

    # --- weight pre-layout: activation-major, densely gate-packed [i,f,o,g], bf16 ---
    wih_p = _pack_gates(jnp.asarray(wih, f32).T, H, G).astype(mxu_dtype)      # (C_in, G)
    whh_p = _pack_gates(jnp.asarray(whh, f32).T, H, G).astype(mxu_dtype)      # (H, G)
    b_p = _pack_gates((jnp.asarray(bih, f32) + jnp.asarray(bhh, f32)
                       ).reshape(1, 4 * H), H, G)                             # (1, G) f32
    w1_p = _pad2(jnp.asarray(w1, f32).T, H, H1p).astype(mxu_dtype)            # (H, H1p)
    b1_p = _pad2(jnp.asarray(b1, f32).reshape(1, H1), 1, H1p)                 # (1, H1p)
    w2_p = _pad2(jnp.asarray(w2, f32).T, H1p, Cp).astype(mxu_dtype)           # (H1p, Cp)
    b2_p = _pad2(jnp.asarray(b2, f32).reshape(1, C_out), 1, Cp)               # (1, Cp)

    len_arr = jnp.zeros((Bp, 1), jnp.int32).at[:B, 0].set(
        jnp.asarray(lens_host, jnp.int32))

    # Time-major 3-D layout (no host-side flatten), sliced to t_max before padding.
    x_tm = jnp.transpose(x[:, :t_max, :], (1, 0, 2))                   # (t_max, B, C_in)
    x_tm = jnp.pad(x_tm, ((0, Tp - t_max), (0, Bp - B), (0, 0)))       # (Tp, Bp, C_in)

    kernel = functools.partial(lstm_var_len_kernel,
                               t_tile=t_tile, bt=bt, hidden=H)

    grid_spec = pltpu.PrefetchScalarGridSpec(
        num_scalar_prefetch=0,
        grid=(n_b, n_t),                                         # batch-parallel, time-serial
        in_specs=[
            pl.BlockSpec((t_tile, bt, C_in), lambda b, t: (t, b, 0)),   # x tile (streamed)
            pl.BlockSpec((bt, 1), lambda b, t: (b, 0)),                 # lengths
            pl.BlockSpec((C_in, G), lambda b, t: (0, 0)),               # W_ih
            pl.BlockSpec((H, G), lambda b, t: (0, 0)),                  # W_hh
            pl.BlockSpec((1, G), lambda b, t: (0, 0)),                  # bias (ih + hh)
            pl.BlockSpec((H, H1p), lambda b, t: (0, 0)),                # W1
            pl.BlockSpec((1, H1p), lambda b, t: (0, 0)),                # b1
            pl.BlockSpec((H1p, Cp), lambda b, t: (0, 0)),               # W2
            pl.BlockSpec((1, Cp), lambda b, t: (0, 0)),                 # b2
        ],
        out_specs=pl.BlockSpec((t_tile, bt, Cp), lambda b, t: (t, b, 0)),
        scratch_shapes=[
            pltpu.VMEM((rows, G), jnp.float32),   # gates_x for this tile
            pltpu.VMEM((rows, H), jnp.float32),   # masked hidden states
            pltpu.VMEM((bt, H), jnp.float32),     # h (persists across time tiles)
            pltpu.VMEM((bt, H), jnp.float32),     # c (persists across time tiles)
        ],
    )

    out = pl.pallas_call(
        kernel,
        out_shape=jax.ShapeDtypeStruct((Tp, Bp, Cp), jnp.float32),
        grid_spec=grid_spec,
        compiler_params=pltpu.CompilerParams(
            # batch tiles shard across TensorCores; time carries the recurrence.
            dimension_semantics=("parallel", "arbitrary"),
            vmem_limit_bytes=32 * 1024 * 1024),   # fits v7x's 64 MiB with headroom
    )(x_tm, len_arr, wih_p, whh_p, b_p, w1_p, b1_p, w2_p, b2_p)

    out = out[:t_max, :B, :C_out]
    return jnp.transpose(out, (1, 0, 2))          # (B, t_max, C_out)


def reference_forward(x, lengths, params):
    """Pure-JAX f32 reference matching PyTorch pack/pad LSTM + linear1 + linear2."""
    x = jnp.asarray(x, jnp.float32)
    B, T, _ = x.shape
    H = params["w_hh"].shape[1]
    wih, whh = params["w_ih"], params["w_hh"]
    b = params["b_ih"] + params["b_hh"]
    w1, b1, w2, b2 = params["w1"], params["b1"], params["w2"], params["b2"]
    lens = jnp.asarray([int(v) for v in list(lengths)], jnp.int32)
    h = jnp.zeros((B, H), jnp.float32)
    c = jnp.zeros((B, H), jnp.float32)
    outs = []
    for t in range(T):
        g = x[:, t, :] @ wih.T + h @ whh.T + b
        i_g = jax.nn.sigmoid(g[:, 0 * H:1 * H])
        f_g = jax.nn.sigmoid(g[:, 1 * H:2 * H])
        g_g = jnp.tanh(g[:, 2 * H:3 * H])
        o_g = jax.nn.sigmoid(g[:, 3 * H:4 * H])
        c_new = f_g * c + i_g * g_g
        h_new = o_g * jnp.tanh(c_new)
        valid = (t < lens)[:, None]
        h = jnp.where(valid, h_new, h)
        c = jnp.where(valid, c_new, c)
        outs.append(jnp.where(valid, h_new, 0.0))
    hseq = jnp.stack(outs, axis=1)                       # (B, T, H)
    y = hseq @ w1.T + b1
    y = y @ w2.T + b2
    t_max = max(int(v) for v in list(lengths))
    return y[:, :t_max, :]


def init_params(key, in_channels, hidden_channels, hidden_1, out_channels):
    """Deterministic synthetic init matching the PyTorch parameter shapes."""
    ks = jax.random.split(key, 8)
    H = hidden_channels
    s_lstm = 1.0 / jnp.sqrt(H)
    s_l1 = 1.0 / jnp.sqrt(H)
    s_l2 = 1.0 / jnp.sqrt(hidden_1)
    u = lambda k, shape, s: jax.random.uniform(k, shape, jnp.float32, -s, s)
    return {
        "w_ih": u(ks[0], (4 * H, in_channels), s_lstm),
        "w_hh": u(ks[1], (4 * H, H), s_lstm),
        "b_ih": u(ks[2], (4 * H,), s_lstm),
        "b_hh": u(ks[3], (4 * H,), s_lstm),
        "w1": u(ks[4], (hidden_1, H), s_l1),
        "b1": u(ks[5], (hidden_1,), s_l1),
        "w2": u(ks[6], (out_channels, hidden_1), s_l2),
        "b2": u(ks[7], (out_channels,), s_l2),
    }


if __name__ == "__main__":
    B, T = 2, 8
    in_channels, hidden_channels, hidden_1, out_channels = 4, 32, 16, 8

    key = jax.random.PRNGKey(0)
    k_x, k_p = jax.random.split(key)
    x = jax.random.normal(k_x, (B, T, in_channels), jnp.float32)
    lengths = [T, 5]  # variable lengths, max == T

    params = init_params(k_p, in_channels, hidden_channels, hidden_1, out_channels)

    out = lstm_variable_length_forward(x, lengths, params, t_tile=32)
    out = jax.block_until_ready(out)

    assert out.shape == (B, max(lengths), out_channels), out.shape
    assert bool(jnp.all(jnp.isfinite(out)))

    # Numerics check vs pure-JAX f32 reference (bf16 MXU operands, f32 accumulate).
    ref = reference_forward(x, lengths, params)
    max_err = float(jnp.max(jnp.abs(out - ref)))
    assert max_err < 5e-2, f"max abs error vs reference: {max_err}"

    print("KERNEL_OK")
</pallas_src>

<mosaic_0001>
module attributes {stable_mosaic.version = 11 : i64} {
  func.func @lstm_var_len_kernel(%arg0: i32, %arg1: i32, %arg2: memref<8x8x4xf32, #tpu.memory_space<vmem>>, %arg3: memref<8x1xi32, #tpu.memory_space<vmem>>, %arg4: memref<4x128xbf16, #tpu.memory_space<vmem>>, %arg5: memref<32x128xbf16, #tpu.memory_space<vmem>>, %arg6: memref<1x128xf32, #tpu.memory_space<vmem>>, %arg7: memref<32x128xbf16, #tpu.memory_space<vmem>>, %arg8: memref<1x128xf32, #tpu.memory_space<vmem>>, %arg9: memref<128x128xbf16, #tpu.memory_space<vmem>>, %arg10: memref<1x128xf32, #tpu.memory_space<vmem>>, %arg11: memref<8x8x128xf32, #tpu.memory_space<vmem>>, %arg12: memref<64x128xf32, #tpu.memory_space<vmem>>, %arg13: memref<64x32xf32, #tpu.memory_space<vmem>>, %arg14: memref<8x32xf32, #tpu.memory_space<vmem>>, %arg15: memref<8x32xf32, #tpu.memory_space<vmem>>) attributes {dimension_semantics = [#tpu.dimension_semantics<parallel>, #tpu.dimension_semantics<arbitrary>], iteration_bounds = array<i64: 1, 1>, scalar_prefetch = 0 : i64, scratch_operands = 4 : i64, tpu.core_type = #tpu.core_type<tc>, window_params = [{transform_indices = @transform_0, window_bounds = array<i64: 8, 8, 4>}, {transform_indices = @transform_1, window_bounds = array<i64: 8, 1>}, {pipeline_mode = #tpu.pipeline_mode<synchronous>, transform_indices = @transform_2, window_bounds = array<i64: 4, 128>}, {pipeline_mode = #tpu.pipeline_mode<synchronous>, transform_indices = @transform_3, window_bounds = array<i64: 32, 128>}, {pipeline_mode = #tpu.pipeline_mode<synchronous>, transform_indices = @transform_4, window_bounds = array<i64: 1, 128>}, {pipeline_mode = #tpu.pipeline_mode<synchronous>, transform_indices = @transform_5, window_bounds = array<i64: 32, 128>}, {pipeline_mode = #tpu.pipeline_mode<synchronous>, transform_indices = @transform_6, window_bounds = array<i64: 1, 128>}, {pipeline_mode = #tpu.pipeline_mode<synchronous>, transform_indices = @transform_7, window_bounds = array<i64: 128, 128>}, {pipeline_mode = #tpu.pipeline_mode<synchronous>, transform_indices = @transform_8, window_bounds = array<i64: 1, 128>}, {transform_indices = @transform_9, window_bounds = array<i64: 8, 8, 128>}]} {
    %c0_i32 = arith.constant 0 : i32
    %0 = arith.cmpi eq, %arg1, %c0_i32 : i32
    %1 = arith.extui %0 : i1 to i32
    %c0_i32_0 = arith.constant 0 : i32
    %2 = arith.cmpi ne, %1, %c0_i32_0 : i32
    scf.if %2 {
      %cst_100 = arith.constant 0.000000e+00 : f32
      %313 = vector.broadcast %cst_100 : f32 to vector<8x32xf32>
      %c0_101 = arith.constant 0 : index
      %c0_102 = arith.constant 0 : index
      %314 = vector.load %arg14[%c0_101, %c0_102] : memref<8x32xf32, #tpu.memory_space<vmem>>, vector<8x32xf32>
      tpu.vector_store %arg14[%c0_101, %c0_102], %313 {strides = array<i32>} : memref<8x32xf32, #tpu.memory_space<vmem>>, vector<8x32xf32>,
      %cst_103 = arith.constant 0.000000e+00 : f32
      %315 = vector.broadcast %cst_103 : f32 to vector<8x32xf32>
      %c0_104 = arith.constant 0 : index
      %c0_105 = arith.constant 0 : index
      %316 = vector.load %arg15[%c0_104, %c0_105] : memref<8x32xf32, #tpu.memory_space<vmem>>, vector<8x32xf32>
      tpu.vector_store %arg15[%c0_104, %c0_105], %315 {strides = array<i32>} : memref<8x32xf32, #tpu.memory_space<vmem>>, vector<8x32xf32>,
    } else {
    }
    %c0 = arith.constant 0 : index
    %c0_1 = arith.constant 0 : index
    %c0_2 = arith.constant 0 : index
    %3 = vector.load %arg2[%c0, %c0_1, %c0_2] : memref<8x8x4xf32, #tpu.memory_space<vmem>>, vector<8x8x4xf32>
    %4 = vector.shape_cast %3 : vector<8x8x4xf32> to vector<64x4xf32>
    %5 = arith.truncf %4 : vector<64x4xf32> to vector<64x4xbf16>
    %c0_3 = arith.constant 0 : index
    %c0_4 = arith.constant 0 : index
    %6 = vector.load %arg4[%c0_3, %c0_4] : memref<4x128xbf16, #tpu.memory_space<vmem>>, vector<4x128xbf16>
    %cst = arith.constant dense<0.000000e+00> : vector<64x128xf32>
    %7 = tpu.matmul %5, %6, %cst {dimension_numbers = #tpu.dot_dimension_numbers<[1], [0], [0], [1], [0, 0, 1, 1], [], []>} : vector<64x4xbf16>, vector<4x128xbf16>, vector<64x128xf32> -> vector<64x128xf32>
    %c0_5 = arith.constant 0 : index
    %c0_6 = arith.constant 0 : index
    %8 = vector.load %arg6[%c0_5, %c0_6] : memref<1x128xf32, #tpu.memory_space<vmem>>, vector<1x128xf32>
    %9 = vector.broadcast %8 : vector<1x128xf32> to vector<64x128xf32>
    %10 = arith.addf %7, %9 : vector<64x128xf32>
    %c0_7 = arith.constant 0 : index
    %c0_8 = arith.constant 0 : index
    %11 = vector.load %arg12[%c0_7, %c0_8] : memref<64x128xf32, #tpu.memory_space<vmem>>, vector<64x128xf32>
    tpu.vector_store %arg12[%c0_7, %c0_8], %10 {strides = array<i32>} : memref<64x128xf32, #tpu.memory_space<vmem>>, vector<64x128xf32>,
    %c0_9 = arith.constant 0 : index
    %c0_10 = arith.constant 0 : index
    %12 = vector.load %arg3[%c0_9, %c0_10] : memref<8x1xi32, #tpu.memory_space<vmem>>, vector<8x1xi32>
    %c8_i32 = arith.constant 8 : i32
    %13 = arith.muli %arg1, %c8_i32 : i32
    %c0_11 = arith.constant 0 : index
    %c0_12 = arith.constant 0 : index
    %14 = vector.load %arg14[%c0_11, %c0_12] : memref<8x32xf32, #tpu.memory_space<vmem>>, vector<8x32xf32>
    %c0_13 = arith.constant 0 : index
    %c0_14 = arith.constant 0 : index
    %15 = vector.load %arg15[%c0_13, %c0_14] : memref<8x32xf32, #tpu.memory_space<vmem>>, vector<8x32xf32>
    %c0_15 = arith.constant 0 : index
    %c0_16 = arith.constant 0 : index
    %16 = vector.load %arg12[%c0_15, %c0_16] : memref<64x128xf32, #tpu.memory_space<vmem>>, vector<8x128xf32>
    %17 = arith.truncf %14 : vector<8x32xf32> to vector<8x32xbf16>
    %c0_17 = arith.constant 0 : index
    %c0_18 = arith.constant 0 : index
    %18 = vector.load %arg5[%c0_17, %c0_18] : memref<32x128xbf16, #tpu.memory_space<vmem>>, vector<32x128xbf16>
    %cst_19 = arith.constant dense<0.000000e+00> : vector<8x128xf32>
    %19 = tpu.matmul %17, %18, %cst_19 {dimension_numbers = #tpu.dot_dimension_numbers<[1], [0], [0], [1], [0, 0, 1, 1], [], []>} : vector<8x32xbf16>, vector<32x128xbf16>, vector<8x128xf32> -> vector<8x128xf32>
    %20 = arith.addf %16, %19 : vector<8x128xf32>
    %21 = vector.extract_strided_slice %20 {offsets = [0, 0], sizes = [8, 96], strides = [1, 1]} : vector<8x128xf32> to vector<8x96xf32>
    %22 = arith.negf %21 : vector<8x96xf32>
    %23 = math.exp %22 : vector<8x96xf32>
    %cst_20 = arith.constant 1.000000e+00 : f32
    %24 = vector.broadcast %cst_20 : f32 to vector<8x96xf32>
    %25 = arith.addf %24, %23 : vector<8x96xf32>
    %26 = arith.divf %24, %25 : vector<8x96xf32>
    %27 = vector.extract_strided_slice %26 {offsets = [0, 0], sizes = [8, 32], strides = [1, 1]} : vector<8x96xf32> to vector<8x32xf32>
    %28 = vector.extract_strided_slice %26 {offsets = [0, 32], sizes = [8, 32], strides = [1, 1]} : vector<8x96xf32> to vector<8x32xf32>
    %29 = vector.extract_strided_slice %26 {offsets = [0, 64], sizes = [8, 32], strides = [1, 1]} : vector<8x96xf32> to vector<8x32xf32>
    %30 = vector.extract_strided_slice %20 {offsets = [0, 96], sizes = [8, 32], strides = [1, 1]} : vector<8x128xf32> to vector<8x32xf32>
    %31 = math.tanh %30 : vector<8x32xf32>
    %32 = arith.mulf %28, %15 : vector<8x32xf32>
    %33 = arith.mulf %27, %31 : vector<8x32xf32>
    %34 = arith.addf %32, %33 : vector<8x32xf32>
    %35 = math.tanh %34 : vector<8x32xf32>
    %36 = arith.mulf %29, %35 : vector<8x32xf32>
    %c0_i32_21 = arith.constant 0 : i32
    %37 = arith.addi %13, %c0_i32_21 : i32
    %38 = vector.broadcast %37 : i32 to vector<8x1xi32>
    %39 = arith.cmpi slt, %38, %12 : vector<8x1xi32>
    %40 = vector.shape_cast %39 : vector<8x1xi1> to vector<8x1xi1>
    %41 = vector.broadcast %40 : vector<8x1xi1> to vector<8x32xi1>
    %42 = arith.select %41, %36, %14 : vector<8x32xi1>, vector<8x32xf32>
    %43 = vector.shape_cast %39 : vector<8x1xi1> to vector<8x1xi1>
    %44 = vector.broadcast %43 : vector<8x1xi1> to vector<8x32xi1>
    %45 = arith.select %44, %34, %15 : vector<8x32xi1>, vector<8x32xf32>
    %cst_22 = arith.constant 0.000000e+00 : f32
    %46 = vector.shape_cast %39 : vector<8x1xi1> to vector<8x1xi1>
    %47 = vector.broadcast %46 : vector<8x1xi1> to vector<8x32xi1>
    %48 = vector.broadcast %cst_22 : f32 to vector<8x32xf32>
    %49 = arith.select %47, %36, %48 : vector<8x32xi1>, vector<8x32xf32>
    %c0_23 = arith.constant 0 : index
    %c0_24 = arith.constant 0 : index
    %50 = vector.load %arg13[%c0_23, %c0_24] : memref<64x32xf32, #tpu.memory_space<vmem>>, vector<8x32xf32>
    tpu.vector_store %arg13[%c0_23, %c0_24], %49 {strides = array<i32>} : memref<64x32xf32, #tpu.memory_space<vmem>>, vector<8x32xf32>,
    %c8 = arith.constant 8 : index
    %c0_25 = arith.constant 0 : index
    %51 = vector.load %arg12[%c8, %c0_25] : memref<64x128xf32, #tpu.memory_space<vmem>>, vector<8x128xf32>
    %52 = arith.truncf %42 : vector<8x32xf32> to vector<8x32xbf16>
    %c0_26 = arith.constant 0 : index
    %c0_27 = arith.constant 0 : index
    %53 = vector.load %arg5[%c0_26, %c0_27] : memref<32x128xbf16, #tpu.memory_space<vmem>>, vector<32x128xbf16>
    %cst_28 = arith.constant dense<0.000000e+00> : vector<8x128xf32>
    %54 = tpu.matmul %52, %53, %cst_28 {dimension_numbers = #tpu.dot_dimension_numbers<[1], [0], [0], [1], [0, 0, 1, 1], [], []>} : vector<8x32xbf16>, vector<32x128xbf16>, vector<8x128xf32> -> vector<8x128xf32>
    %55 = arith.addf %51, %54 : vector<8x128xf32>
    %56 = vector.extract_strided_slice %55 {offsets = [0, 0], sizes = [8, 96], strides = [1, 1]} : vector<8x128xf32> to vector<8x96xf32>
    %57 = arith.negf %56 : vector<8x96xf32>
    %58 = math.exp %57 : vector<8x96xf32>
    %cst_29 = arith.constant 1.000000e+00 : f32
    %59 = vector.broadcast %cst_29 : f32 to vector<8x96xf32>
    %60 = arith.addf %59, %58 : vector<8x96xf32>
    %61 = arith.divf %59, %60 : vector<8x96xf32>
    %62 = vector.extract_strided_slice %61 {offsets = [0, 0], sizes = [8, 32], strides = [1, 1]} : vector<8x96xf32> to vector<8x32xf32>
    %63 = vector.extract_strided_slice %61 {offsets = [0, 32], sizes = [8, 32], strides = [1, 1]} : vector<8x96xf32> to vector<8x32xf32>
    %64 = vector.extract_strided_slice %61 {offsets = [0, 64], sizes = [8, 32], strides = [1, 1]} : vector<8x96xf32> to vector<8x32xf32>
    %65 = vector.extract_strided_slice %55 {offsets = [0, 96], sizes = [8, 32], strides = [1, 1]} : vector<8x128xf32> to vector<8x32xf32>
    %66 = math.tanh %65 : vector<8x32xf32>
    %67 = arith.mulf %63, %45 : vector<8x32xf32>
    %68 = arith.mulf %62, %66 : vector<8x32xf32>
    %69 = arith.addf %67, %68 : vector<8x32xf32>
    %70 = math.tanh %69 : vector<8x32xf32>
    %71 = arith.mulf %64, %70 : vector<8x32xf32>
    %c1_i32 = arith.constant 1 : i32
    %72 = arith.addi %13, %c1_i32 : i32
    %73 = vector.broadcast %72 : i32 to vector<8x1xi32>
    %74 = arith.cmpi slt, %73, %12 : vector<8x1xi32>
    %75 = vector.shape_cast %74 : vector<8x1xi1> to vector<8x1xi1>
    %76 = vector.broadcast %75 : vector<8x1xi1> to vector<8x32xi1>
    %77 = arith.select %76, %71, %42 : vector<8x32xi1>, vector<8x32xf32>
    %78 = vector.shape_cast %74 : vector<8x1xi1> to vector<8x1xi1>
    %79 = vector.broadcast %78 : vector<8x1xi1> to vector<8x32xi1>
    %80 = arith.select %79, %69, %45 : vector<8x32xi1>, vector<8x32xf32>
    %cst_30 = arith.constant 0.000000e+00 : f32
    %81 = vector.shape_cast %74 : vector<8x1xi1> to vector<8x1xi1>
    %82 = vector.broadcast %81 : vector<8x1xi1> to vector<8x32xi1>
    %83 = vector.broadcast %cst_30 : f32 to vector<8x32xf32>
    %84 = arith.select %82, %71, %83 : vector<8x32xi1>, vector<8x32xf32>
    %c8_31 = arith.constant 8 : index
    %c0_32 = arith.constant 0 : index
    %85 = vector.load %arg13[%c8_31, %c0_32] : memref<64x32xf32, #tpu.memory_space<vmem>>, vector<8x32xf32>
    tpu.vector_store %arg13[%c8_31, %c0_32], %84 {strides = array<i32>} : memref<64x32xf32, #tpu.memory_space<vmem>>, vector<8x32xf32>,
    %c16 = arith.constant 16 : index
    %c0_33 = arith.constant 0 : index
    %86 = vector.load %arg12[%c16, %c0_33] : memref<64x128xf32, #tpu.memory_space<vmem>>, vector<8x128xf32>
    %87 = arith.truncf %77 : vector<8x32xf32> to vector<8x32xbf16>
    %c0_34 = arith.constant 0 : index
    %c0_35 = arith.constant 0 : index
    %88 = vector.load %arg5[%c0_34, %c0_35] : memref<32x128xbf16, #tpu.memory_space<vmem>>, vector<32x128xbf16>
    %cst_36 = arith.constant dense<0.000000e+00> : vector<8x128xf32>
    %89 = tpu.matmul %87, %88, %cst_36 {dimension_numbers = #tpu.dot_dimension_numbers<[1], [0], [0], [1], [0, 0, 1, 1], [], []>} : vector<8x32xbf16>, vector<32x128xbf16>, vector<8x128xf32> -> vector<8x128xf32>
    %90 = arith.addf %86, %89 : vector<8x128xf32>
    %91 = vector.extract_strided_slice %90 {offsets = [0, 0], sizes = [8, 96], strides = [1, 1]} : vector<8x128xf32> to vector<8x96xf32>
    %92 = arith.negf %91 : vector<8x96xf32>
    %93 = math.exp %92 : vector<8x96xf32>
    %cst_37 = arith.constant 1.000000e+00 : f32
    %94 = vector.broadcast %cst_37 : f32 to vector<8x96xf32>
    %95 = arith.addf %94, %93 : vector<8x96xf32>
    %96 = arith.divf %94, %95 : vector<8x96xf32>
    %97 = vector.extract_strided_slice %96 {offsets = [0, 0], sizes = [8, 32], strides = [1, 1]} : vector<8x96xf32> to vector<8x32xf32>
    %98 = vector.extract_strided_slice %96 {offsets = [0, 32], sizes = [8, 32], strides = [1, 1]} : vector<8x96xf32> to vector<8x32xf32>
    %99 = vector.extract_strided_slice %96 {offsets = [0, 64], sizes = [8, 32], strides = [1, 1]} : vector<8x96xf32> to vector<8x32xf32>
    %100 = vector.extract_strided_slice %90 {offsets = [0, 96], sizes = [8, 32], strides = [1, 1]} : vector<8x128xf32> to vector<8x32xf32>
    %101 = math.tanh %100 : vector<8x32xf32>
    %102 = arith.mulf %98, %80 : vector<8x32xf32>
    %103 = arith.mulf %97, %101 : vector<8x32xf32>
    %104 = arith.addf %102, %103 : vector<8x32xf32>
    %105 = math.tanh %104 : vector<8x32xf32>
    %106 = arith.mulf %99, %105 : vector<8x32xf32>
    %c2_i32 = arith.constant 2 : i32
    %107 = arith.addi %13, %c2_i32 : i32
    %108 = vector.broadcast %107 : i32 to vector<8x1xi32>
    %109 = arith.cmpi slt, %108, %12 : vector<8x1xi32>
    %110 = vector.shape_cast %109 : vector<8x1xi1> to vector<8x1xi1>
    %111 = vector.broadcast %110 : vector<8x1xi1> to vector<8x32xi1>
    %112 = arith.select %111, %106, %77 : vector<8x32xi1>, vector<8x32xf32>
    %113 = vector.shape_cast %109 : vector<8x1xi1> to vector<8x1xi1>
    %114 = vector.broadcast %113 : vector<8x1xi1> to vector<8x32xi1>
    %115 = arith.select %114, %104, %80 : vector<8x32xi1>, vector<8x32xf32>
    %cst_38 = arith.constant 0.000000e+00 : f32
    %116 = vector.shape_cast %109 : vector<8x1xi1> to vector<8x1xi1>
    %117 = vector.broadcast %116 : vector<8x1xi1> to vector<8x32xi1>
    %118 = vector.broadcast %cst_38 : f32 to vector<8x32xf32>
    %119 = arith.select %117, %106, %118 : vector<8x32xi1>, vector<8x32xf32>
    %c16_39 = arith.constant 16 : index
    %c0_40 = arith.constant 0 : index
    %120 = vector.load %arg13[%c16_39, %c0_40] : memref<64x32xf32, #tpu.memory_space<vmem>>, vector<8x32xf32>
    tpu.vector_store %arg13[%c16_39, %c0_40], %119 {strides = array<i32>} : memref<64x32xf32, #tpu.memory_space<vmem>>, vector<8x32xf32>,
    %c24 = arith.constant 24 : index
    %c0_41 = arith.constant 0 : index
    %121 = vector.load %arg12[%c24, %c0_41] : memref<64x128xf32, #tpu.memory_space<vmem>>, vector<8x128xf32>
    %122 = arith.truncf %112 : vector<8x32xf32> to vector<8x32xbf16>
    %c0_42 = arith.constant 0 : index
    %c0_43 = arith.constant 0 : index
    %123 = vector.load %arg5[%c0_42, %c0_43] : memref<32x128xbf16, #tpu.memory_space<vmem>>, vector<32x128xbf16>
    %cst_44 = arith.constant dense<0.000000e+00> : vector<8x128xf32>
    %124 = tpu.matmul %122, %123, %cst_44 {dimension_numbers = #tpu.dot_dimension_numbers<[1], [0], [0], [1], [0, 0, 1, 1], [], []>} : vector<8x32xbf16>, vector<32x128xbf16>, vector<8x128xf32> -> vector<8x128xf32>
    %125 = arith.addf %121, %124 : vector<8x128xf32>
    %126 = vector.extract_strided_slice %125 {offsets = [0, 0], sizes = [8, 96], strides = [1, 1]} : vector<8x128xf32> to vector<8x96xf32>
    %127 = arith.negf %126 : vector<8x96xf32>
    %128 = math.exp %127 : vector<8x96xf32>
    %cst_45 = arith.constant 1.000000e+00 : f32
    %129 = vector.broadcast %cst_45 : f32 to vector<8x96xf32>
    %130 = arith.addf %129, %128 : vector<8x96xf32>
    %131 = arith.divf %129, %130 : vector<8x96xf32>
    %132 = vector.extract_strided_slice %131 {offsets = [0, 0], sizes = [8, 32], strides = [1, 1]} : vector<8x96xf32> to vector<8x32xf32>
    %133 = vector.extract_strided_slice %131 {offsets = [0, 32], sizes = [8, 32], strides = [1, 1]} : vector<8x96xf32> to vector<8x32xf32>
    %134 = vector.extract_strided_slice %131 {offsets = [0, 64], sizes = [8, 32], strides = [1, 1]} : vector<8x96xf32> to vector<8x32xf32>
    %135 = vector.extract_strided_slice %125 {offsets = [0, 96], sizes = [8, 32], strides = [1, 1]} : vector<8x128xf32> to vector<8x32xf32>
    %136 = math.tanh %135 : vector<8x32xf32>
    %137 = arith.mulf %133, %115 : vector<8x32xf32>
    %138 = arith.mulf %132, %136 : vector<8x32xf32>
    %139 = arith.addf %137, %138 : vector<8x32xf32>
    %140 = math.tanh %139 : vector<8x32xf32>
    %141 = arith.mulf %134, %140 : vector<8x32xf32>
    %c3_i32 = arith.constant 3 : i32
    %142 = arith.addi %13, %c3_i32 : i32
    %143 = vector.broadcast %142 : i32 to vector<8x1xi32>
    %144 = arith.cmpi slt, %143, %12 : vector<8x1xi32>
    %145 = vector.shape_cast %144 : vector<8x1xi1> to vector<8x1xi1>
    %146 = vector.broadcast %145 : vector<8x1xi1> to vector<8x32xi1>
    %147 = arith.select %146, %141, %112 : vector<8x32xi1>, vector<8x32xf32>
    %148 = vector.shape_cast %144 : vector<8x1xi1> to vector<8x1xi1>
    %149 = vector.broadcast %148 : vector<8x1xi1> to vector<8x32xi1>
    %150 = arith.select %149, %139, %115 : vector<8x32xi1>, vector<8x32xf32>
    %cst_46 = arith.constant 0.000000e+00 : f32
    %151 = vector.shape_cast %144 : vector<8x1xi1> to vector<8x1xi1>
    %152 = vector.broadcast %151 : vector<8x1xi1> to vector<8x32xi1>
    %153 = vector.broadcast %cst_46 : f32 to vector<8x32xf32>
    %154 = arith.select %152, %141, %153 : vector<8x32xi1>, vector<8x32xf32>
    %c24_47 = arith.constant 24 : index
    %c0_48 = arith.constant 0 : index
    %155 = vector.load %arg13[%c24_47, %c0_48] : memref<64x32xf32, #tpu.memory_space<vmem>>, vector<8x32xf32>
    tpu.vector_store %arg13[%c24_47, %c0_48], %154 {strides = array<i32>} : memref<64x32xf32, #tpu.memory_space<vmem>>, vector<8x32xf32>,
    %c32 = arith.constant 32 : index
    %c0_49 = arith.constant 0 : index
    %156 = vector.load %arg12[%c32, %c0_49] : memref<64x128xf32, #tpu.memory_space<vmem>>, vector<8x128xf32>
    %157 = arith.truncf %147 : vector<8x32xf32> to vector<8x32xbf16>
    %c0_50 = arith.constant 0 : index
    %c0_51 = arith.constant 0 : index
    %158 = vector.load %arg5[%c0_50, %c0_51] : memref<32x128xbf16, #tpu.memory_space<vmem>>, vector<32x128xbf16>
    %cst_52 = arith.constant dense<0.000000e+00> : vector<8x128xf32>
    %159 = tpu.matmul %157, %158, %cst_52 {dimension_numbers = #tpu.dot_dimension_numbers<[1], [0], [0], [1], [0, 0, 1, 1], [], []>} : vector<8x32xbf16>, vector<32x128xbf16>, vector<8x128xf32> -> vector<8x128xf32>
    %160 = arith.addf %156, %159 : vector<8x128xf32>
    %161 = vector.extract_strided_slice %160 {offsets = [0, 0], sizes = [8, 96], strides = [1, 1]} : vector<8x128xf32> to vector<8x96xf32>
    %162 = arith.negf %161 : vector<8x96xf32>
    %163 = math.exp %162 : vector<8x96xf32>
    %cst_53 = arith.constant 1.000000e+00 : f32
    %164 = vector.broadcast %cst_53 : f32 to vector<8x96xf32>
    %165 = arith.addf %164, %163 : vector<8x96xf32>
    %166 = arith.divf %164, %165 : vector<8x96xf32>
    %167 = vector.extract_strided_slice %166 {offsets = [0, 0], sizes = [8, 32], strides = [1, 1]} : vector<8x96xf32> to vector<8x32xf32>
    %168 = vector.extract_strided_slice %166 {offsets = [0, 32], sizes = [8, 32], strides = [1, 1]} : vector<8x96xf32> to vector<8x32xf32>
    %169 = vector.extract_strided_slice %166 {offsets = [0, 64], sizes = [8, 32], strides = [1, 1]} : vector<8x96xf32> to vector<8x32xf32>
    %170 = vector.extract_strided_slice %160 {offsets = [0, 96], sizes = [8, 32], strides = [1, 1]} : vector<8x128xf32> to vector<8x32xf32>
    %171 = math.tanh %170 : vector<8x32xf32>
    %172 = arith.mulf %168, %150 : vector<8x32xf32>
    %173 = arith.mulf %167, %171 : vector<8x32xf32>
    %174 = arith.addf %172, %173 : vector<8x32xf32>
    %175 = math.tanh %174 : vector<8x32xf32>
    %176 = arith.mulf %169, %175 : vector<8x32xf32>
    %c4_i32 = arith.constant 4 : i32
    %177 = arith.addi %13, %c4_i32 : i32
    %178 = vector.broadcast %177 : i32 to vector<8x1xi32>
    %179 = arith.cmpi slt, %178, %12 : vector<8x1xi32>
    %180 = vector.shape_cast %179 : vector<8x1xi1> to vector<8x1xi1>
    %181 = vector.broadcast %180 : vector<8x1xi1> to vector<8x32xi1>
    %182 = arith.select %181, %176, %147 : vector<8x32xi1>, vector<8x32xf32>
    %183 = vector.shape_cast %179 : vector<8x1xi1> to vector<8x1xi1>
    %184 = vector.broadcast %183 : vector<8x1xi1> to vector<8x32xi1>
    %185 = arith.select %184, %174, %150 : vector<8x32xi1>, vector<8x32xf32>
    %cst_54 = arith.constant 0.000000e+00 : f32
    %186 = vector.shape_cast %179 : vector<8x1xi1> to vector<8x1xi1>
    %187 = vector.broadcast %186 : vector<8x1xi1> to vector<8x32xi1>
    %188 = vector.broadcast %cst_54 : f32 to vector<8x32xf32>
    %189 = arith.select %187, %176, %188 : vector<8x32xi1>, vector<8x32xf32>
    %c32_55 = arith.constant 32 : index
    %c0_56 = arith.constant 0 : index
    %190 = vector.load %arg13[%c32_55, %c0_56] : memref<64x32xf32, #tpu.memory_space<vmem>>, vector<8x32xf32>
    tpu.vector_store %arg13[%c32_55, %c0_56], %189 {strides = array<i32>} : memref<64x32xf32, #tpu.memory_space<vmem>>, vector<8x32xf32>,
    %c40 = arith.constant 40 : index
    %c0_57 = arith.constant 0 : index
    %191 = vector.load %arg12[%c40, %c0_57] : memref<64x128xf32, #tpu.memory_space<vmem>>, vector<8x128xf32>
    %192 = arith.truncf %182 : vector<8x32xf32> to vector<8x32xbf16>
    %c0_58 = arith.constant 0 : index
    %c0_59 = arith.constant 0 : index
    %193 = vector.load %arg5[%c0_58, %c0_59] : memref<32x128xbf16, #tpu.memory_space<vmem>>, vector<32x128xbf16>
    %cst_60 = arith.constant dense<0.000000e+00> : vector<8x128xf32>
    %194 = tpu.matmul %192, %193, %cst_60 {dimension_numbers = #tpu.dot_dimension_numbers<[1], [0], [0], [1], [0, 0, 1, 1], [], []>} : vector<8x32xbf16>, vector<32x128xbf16>, vector<8x128xf32> -> vector<8x128xf32>
    %195 = arith.addf %191, %194 : vector<8x128xf32>
    %196 = vector.extract_strided_slice %195 {offsets = [0, 0], sizes = [8, 96], strides = [1, 1]} : vector<8x128xf32> to vector<8x96xf32>
    %197 = arith.negf %196 : vector<8x96xf32>
    %198 = math.exp %197 : vector<8x96xf32>
    %cst_61 = arith.constant 1.000000e+00 : f32
    %199 = vector.broadcast %cst_61 : f32 to vector<8x96xf32>
    %200 = arith.addf %199, %198 : vector<8x96xf32>
    %201 = arith.divf %199, %200 : vector<8x96xf32>
    %202 = vector.extract_strided_slice %201 {offsets = [0, 0], sizes = [8, 32], strides = [1, 1]} : vector<8x96xf32> to vector<8x32xf32>
    %203 = vector.extract_strided_slice %201 {offsets = [0, 32], sizes = [8, 32], strides = [1, 1]} : vector<8x96xf32> to vector<8x32xf32>
    %204 = vector.extract_strided_slice %201 {offsets = [0, 64], sizes = [8, 32], strides = [1, 1]} : vector<8x96xf32> to vector<8x32xf32>
    %205 = vector.extract_strided_slice %195 {offsets = [0, 96], sizes = [8, 32], strides = [1, 1]} : vector<8x128xf32> to vector<8x32xf32>
    %206 = math.tanh %205 : vector<8x32xf32>
    %207 = arith.mulf %203, %185 : vector<8x32xf32>
    %208 = arith.mulf %202, %206 : vector<8x32xf32>
    %209 = arith.addf %207, %208 : vector<8x32xf32>
    %210 = math.tanh %209 : vector<8x32xf32>
    %211 = arith.mulf %204, %210 : vector<8x32xf32>
    %c5_i32 = arith.constant 5 : i32
    %212 = arith.addi %13, %c5_i32 : i32
    %213 = vector.broadcast %212 : i32 to vector<8x1xi32>
    %214 = arith.cmpi slt, %213, %12 : vector<8x1xi32>
    %215 = vector.shape_cast %214 : vector<8x1xi1> to vector<8x1xi1>
    %216 = vector.broadcast %215 : vector<8x1xi1> to vector<8x32xi1>
    %217 = arith.select %216, %211, %182 : vector<8x32xi1>, vector<8x32xf32>
    %218 = vector.shape_cast %214 : vector<8x1xi1> to vector<8x1xi1>
    %219 = vector.broadcast %218 : vector<8x1xi1> to vector<8x32xi1>
    %220 = arith.select %219, %209, %185 : vector<8x32xi1>, vector<8x32xf32>
    %cst_62 = arith.constant 0.000000e+00 : f32
    %221 = vector.shape_cast %214 : vector<8x1xi1> to vector<8x1xi1>
    %222 = vector.broadcast %221 : vector<8x1xi1> to vector<8x32xi1>
    %223 = vector.broadcast %cst_62 : f32 to vector<8x32xf32>
    %224 = arith.select %222, %211, %223 : vector<8x32xi1>, vector<8x32xf32>
    %c40_63 = arith.constant 40 : index
    %c0_64 = arith.constant 0 : index
    %225 = vector.load %arg13[%c40_63, %c0_64] : memref<64x32xf32, #tpu.memory_space<vmem>>, vector<8x32xf32>
    tpu.vector_store %arg13[%c40_63, %c0_64], %224 {strides = array<i32>} : memref<64x32xf32, #tpu.memory_space<vmem>>, vector<8x32xf32>,
    %c48 = arith.constant 48 : index
    %c0_65 = arith.constant 0 : index
    %226 = vector.load %arg12[%c48, %c0_65] : memref<64x128xf32, #tpu.memory_space<vmem>>, vector<8x128xf32>
    %227 = arith.truncf %217 : vector<8x32xf32> to vector<8x32xbf16>
    %c0_66 = arith.constant 0 : index
    %c0_67 = arith.constant 0 : index
    %228 = vector.load %arg5[%c0_66, %c0_67] : memref<32x128xbf16, #tpu.memory_space<vmem>>, vector<32x128xbf16>
    %cst_68 = arith.constant dense<0.000000e+00> : vector<8x128xf32>
    %229 = tpu.matmul %227, %228, %cst_68 {dimension_numbers = #tpu.dot_dimension_numbers<[1], [0], [0], [1], [0, 0, 1, 1], [], []>} : vector<8x32xbf16>, vector<32x128xbf16>, vector<8x128xf32> -> vector<8x128xf32>
    %230 = arith.addf %226, %229 : vector<8x128xf32>
    %231 = vector.extract_strided_slice %230 {offsets = [0, 0], sizes = [8, 96], strides = [1, 1]} : vector<8x128xf32> to vector<8x96xf32>
    %232 = arith.negf %231 : vector<8x96xf32>
    %233 = math.exp %232 : vector<8x96xf32>
    %cst_69 = arith.constant 1.000000e+00 : f32
    %234 = vector.broadcast %cst_69 : f32 to vector<8x96xf32>
    %235 = arith.addf %234, %233 : vector<8x96xf32>
    %236 = arith.divf %234, %235 : vector<8x96xf32>
    %237 = vector.extract_strided_slice %236 {offsets = [0, 0], sizes = [8, 32], strides = [1, 1]} : vector<8x96xf32> to vector<8x32xf32>
    %238 = vector.extract_strided_slice %236 {offsets = [0, 32], sizes = [8, 32], strides = [1, 1]} : vector<8x96xf32> to vector<8x32xf32>
    %239 = vector.extract_strided_slice %236 {offsets = [0, 64], sizes = [8, 32], strides = [1, 1]} : vector<8x96xf32> to vector<8x32xf32>
    %240 = vector.extract_strided_slice %230 {offsets = [0, 96], sizes = [8, 32], strides = [1, 1]} : vector<8x128xf32> to vector<8x32xf32>
    %241 = math.tanh %240 : vector<8x32xf32>
    %242 = arith.mulf %238, %220 : vector<8x32xf32>
    %243 = arith.mulf %237, %241 : vector<8x32xf32>
    %244 = arith.addf %242, %243 : vector<8x32xf32>
    %245 = math.tanh %244 : vector<8x32xf32>
    %246 = arith.mulf %239, %245 : vector<8x32xf32>
    %c6_i32 = arith.constant 6 : i32
    %247 = arith.addi %13, %c6_i32 : i32
    %248 = vector.broadcast %247 : i32 to vector<8x1xi32>
    %249 = arith.cmpi slt, %248, %12 : vector<8x1xi32>
    %250 = vector.shape_cast %249 : vector<8x1xi1> to vector<8x1xi1>
    %251 = vector.broadcast %250 : vector<8x1xi1> to vector<8x32xi1>
    %252 = arith.select %251, %246, %217 : vector<8x32xi1>, vector<8x32xf32>
    %253 = vector.shape_cast %249 : vector<8x1xi1> to vector<8x1xi1>
    %254 = vector.broadcast %253 : vector<8x1xi1> to vector<8x32xi1>
    %255 = arith.select %254, %244, %220 : vector<8x32xi1>, vector<8x32xf32>
    %cst_70 = arith.constant 0.000000e+00 : f32
    %256 = vector.shape_cast %249 : vector<8x1xi1> to vector<8x1xi1>
    %257 = vector.broadcast %256 : vector<8x1xi1> to vector<8x32xi1>
    %258 = vector.broadcast %cst_70 : f32 to vector<8x32xf32>
    %259 = arith.select %257, %246, %258 : vector<8x32xi1>, vector<8x32xf32>
    %c48_71 = arith.constant 48 : index
    %c0_72 = arith.constant 0 : index
    %260 = vector.load %arg13[%c48_71, %c0_72] : memref<64x32xf32, #tpu.memory_space<vmem>>, vector<8x32xf32>
    tpu.vector_store %arg13[%c48_71, %c0_72], %259 {strides = array<i32>} : memref<64x32xf32, #tpu.memory_space<vmem>>, vector<8x32xf32>,
    %c56 = arith.constant 56 : index
    %c0_73 = arith.constant 0 : index
    %261 = vector.load %arg12[%c56, %c0_73] : memref<64x128xf32, #tpu.memory_space<vmem>>, vector<8x128xf32>
    %262 = arith.truncf %252 : vector<8x32xf32> to vector<8x32xbf16>
    %c0_74 = arith.constant 0 : index
    %c0_75 = arith.constant 0 : index
    %263 = vector.load %arg5[%c0_74, %c0_75] : memref<32x128xbf16, #tpu.memory_space<vmem>>, vector<32x128xbf16>
    %cst_76 = arith.constant dense<0.000000e+00> : vector<8x128xf32>
    %264 = tpu.matmul %262, %263, %cst_76 {dimension_numbers = #tpu.dot_dimension_numbers<[1], [0], [0], [1], [0, 0, 1, 1], [], []>} : vector<8x32xbf16>, vector<32x128xbf16>, vector<8x128xf32> -> vector<8x128xf32>
    %265 = arith.addf %261, %264 : vector<8x128xf32>
    %266 = vector.extract_strided_slice %265 {offsets = [0, 0], sizes = [8, 96], strides = [1, 1]} : vector<8x128xf32> to vector<8x96xf32>
    %267 = arith.negf %266 : vector<8x96xf32>
    %268 = math.exp %267 : vector<8x96xf32>
    %cst_77 = arith.constant 1.000000e+00 : f32
    %269 = vector.broadcast %cst_77 : f32 to vector<8x96xf32>
    %270 = arith.addf %269, %268 : vector<8x96xf32>
    %271 = arith.divf %269, %270 : vector<8x96xf32>
    %272 = vector.extract_strided_slice %271 {offsets = [0, 0], sizes = [8, 32], strides = [1, 1]} : vector<8x96xf32> to vector<8x32xf32>
    %273 = vector.extract_strided_slice %271 {offsets = [0, 32], sizes = [8, 32], strides = [1, 1]} : vector<8x96xf32> to vector<8x32xf32>
    %274 = vector.extract_strided_slice %271 {offsets = [0, 64], sizes = [8, 32], strides = [1, 1]} : vector<8x96xf32> to vector<8x32xf32>
    %275 = vector.extract_strided_slice %265 {offsets = [0, 96], sizes = [8, 32], strides = [1, 1]} : vector<8x128xf32> to vector<8x32xf32>
    %276 = math.tanh %275 : vector<8x32xf32>
    %277 = arith.mulf %273, %255 : vector<8x32xf32>
    %278 = arith.mulf %272, %276 : vector<8x32xf32>
    %279 = arith.addf %277, %278 : vector<8x32xf32>
    %280 = math.tanh %279 : vector<8x32xf32>
    %281 = arith.mulf %274, %280 : vector<8x32xf32>
    %c7_i32 = arith.constant 7 : i32
    %282 = arith.addi %13, %c7_i32 : i32
    %283 = vector.broadcast %282 : i32 to vector<8x1xi32>
    %284 = arith.cmpi slt, %283, %12 : vector<8x1xi32>
    %285 = vector.shape_cast %284 : vector<8x1xi1> to vector<8x1xi1>
    %286 = vector.broadcast %285 : vector<8x1xi1> to vector<8x32xi1>
    %287 = arith.select %286, %281, %252 : vector<8x32xi1>, vector<8x32xf32>
    %288 = vector.shape_cast %284 : vector<8x1xi1> to vector<8x1xi1>
    %289 = vector.broadcast %288 : vector<8x1xi1> to vector<8x32xi1>
    %290 = arith.select %289, %279, %255 : vector<8x32xi1>, vector<8x32xf32>
    %cst_78 = arith.constant 0.000000e+00 : f32
    %291 = vector.shape_cast %284 : vector<8x1xi1> to vector<8x1xi1>
    %292 = vector.broadcast %291 : vector<8x1xi1> to vector<8x32xi1>
    %293 = vector.broadcast %cst_78 : f32 to vector<8x32xf32>
    %294 = arith.select %292, %281, %293 : vector<8x32xi1>, vector<8x32xf32>
    %c56_79 = arith.constant 56 : index
    %c0_80 = arith.constant 0 : index
    %295 = vector.load %arg13[%c56_79, %c0_80] : memref<64x32xf32, #tpu.memory_space<vmem>>, vector<8x32xf32>
    tpu.vector_store %arg13[%c56_79, %c0_80], %294 {strides = array<i32>} : memref<64x32xf32, #tpu.memory_space<vmem>>, vector<8x32xf32>,
    %c0_81 = arith.constant 0 : index
    %c0_82 = arith.constant 0 : index
    %296 = vector.load %arg14[%c0_81, %c0_82] : memref<8x32xf32, #tpu.memory_space<vmem>>, vector<8x32xf32>
    tpu.vector_store %arg14[%c0_81, %c0_82], %287 {strides = array<i32>} : memref<8x32xf32, #tpu.memory_space<vmem>>, vector<8x32xf32>,
    %c0_83 = arith.constant 0 : index
    %c0_84 = arith.constant 0 : index
    %297 = vector.load %arg15[%c0_83, %c0_84] : memref<8x32xf32, #tpu.memory_space<vmem>>, vector<8x32xf32>
    tpu.vector_store %arg15[%c0_83, %c0_84], %290 {strides = array<i32>} : memref<8x32xf32, #tpu.memory_space<vmem>>, vector<8x32xf32>,
    %c0_85 = arith.constant 0 : index
    %c0_86 = arith.constant 0 : index
    %298 = vector.load %arg13[%c0_85, %c0_86] : memref<64x32xf32, #tpu.memory_space<vmem>>, vector<64x32xf32>
    %299 = arith.truncf %298 : vector<64x32xf32> to vector<64x32xbf16>
    %c0_87 = arith.constant 0 : index
    %c0_88 = arith.constant 0 : index
    %300 = vector.load %arg7[%c0_87, %c0_88] : memref<32x128xbf16, #tpu.memory_space<vmem>>, vector<32x128xbf16>
    %cst_89 = arith.constant dense<0.000000e+00> : vector<64x128xf32>
    %301 = tpu.matmul %299, %300, %cst_89 {dimension_numbers = #tpu.dot_dimension_numbers<[1], [0], [0], [1], [0, 0, 1, 1], [], []>} : vector<64x32xbf16>, vector<32x128xbf16>, vector<64x128xf32> -> vector<64x128xf32>
    %c0_90 = arith.constant 0 : index
    %c0_91 = arith.constant 0 : index
    %302 = vector.load %arg8[%c0_90, %c0_91] : memref<1x128xf32, #tpu.memory_space<vmem>>, vector<1x128xf32>
    %303 = vector.broadcast %302 : vector<1x128xf32> to vector<64x128xf32>
    %304 = arith.addf %301, %303 : vector<64x128xf32>
    %305 = arith.truncf %304 : vector<64x128xf32> to vector<64x128xbf16>
    %c0_92 = arith.constant 0 : index
    %c0_93 = arith.constant 0 : index
    %306 = vector.load %arg9[%c0_92, %c0_93] : memref<128x128xbf16, #tpu.memory_space<vmem>>, vector<128x128xbf16>
    %cst_94 = arith.constant dense<0.000000e+00> : vector<64x128xf32>
    %307 = tpu.matmul %305, %306, %cst_94 {dimension_numbers = #tpu.dot_dimension_numbers<[1], [0], [0], [1], [0, 0, 1, 1], [], []>} : vector<64x128xbf16>, vector<128x128xbf16>, vector<64x128xf32> -> vector<64x128xf32>
    %c0_95 = arith.constant 0 : index
    %c0_96 = arith.constant 0 : index
    %308 = vector.load %arg10[%c0_95, %c0_96] : memref<1x128xf32, #tpu.memory_space<vmem>>, vector<1x128xf32>
    %309 = vector.broadcast %308 : vector<1x128xf32> to vector<64x128xf32>
    %310 = arith.addf %307, %309 : vector<64x128xf32>
    %311 = vector.shape_cast %310 : vector<64x128xf32> to vector<8x8x128xf32>
    %c0_97 = arith.constant 0 : index
    %c0_98 = arith.constant 0 : index
    %c0_99 = arith.constant 0 : index
    %312 = vector.load %arg11[%c0_97, %c0_98, %c0_99] : memref<8x8x128xf32, #tpu.memory_space<vmem>>, vector<8x8x128xf32>
    tpu.vector_store %arg11[%c0_97, %c0_98, %c0_99], %311 {strides = array<i32>} : memref<8x8x128xf32, #tpu.memory_space<vmem>>, vector<8x8x128xf32>,
    return
  }
  func.func @transform_0(%arg0: i32, %arg1: i32) -> (i32, i32, i32) {
    %c0_i32 = arith.constant 0 : i32
    %c0_i32_0 = arith.constant 0 : i32
    return %arg1, %arg0, %c0_i32 : i32, i32, i32
  }
  func.func @transform_1(%arg0: i32, %arg1: i32) -> (i32, i32) {
    %c0_i32 = arith.constant 0 : i32
    %c0_i32_0 = arith.constant 0 : i32
    return %arg0, %c0_i32 : i32, i32
  }
  func.func @transform_2(%arg0: i32, %arg1: i32) -> (i32, i32) {
    %c0_i32 = arith.constant 0 : i32
    %c0_i32_0 = arith.constant 0 : i32
    %c0_i32_1 = arith.constant 0 : i32
    return %c0_i32, %c0_i32_0 : i32, i32
  }
  func.func @transform_3(%arg0: i32, %arg1: i32) -> (i32, i32) {
    %c0_i32 = arith.constant 0 : i32
    %c0_i32_0 = arith.constant 0 : i32
    %c0_i32_1 = arith.constant 0 : i32
    return %c0_i32, %c0_i32_0 : i32, i32
  }
  func.func @transform_4(%arg0: i32, %arg1: i32) -> (i32, i32) {
    %c0_i32 = arith.constant 0 : i32
    %c0_i32_0 = arith.constant 0 : i32
    %c0_i32_1 = arith.constant 0 : i32
    return %c0_i32, %c0_i32_0 : i32, i32
  }
  func.func @transform_5(%arg0: i32, %arg1: i32) -> (i32, i32) {
    %c0_i32 = arith.constant 0 : i32
    %c0_i32_0 = arith.constant 0 : i32
    %c0_i32_1 = arith.constant 0 : i32
    return %c0_i32, %c0_i32_0 : i32, i32
  }
  func.func @transform_6(%arg0: i32, %arg1: i32) -> (i32, i32) {
    %c0_i32 = arith.constant 0 : i32
    %c0_i32_0 = arith.constant 0 : i32
    %c0_i32_1 = arith.constant 0 : i32
    return %c0_i32, %c0_i32_0 : i32, i32
  }
  func.func @transform_7(%arg0: i32, %arg1: i32) -> (i32, i32) {
    %c0_i32 = arith.constant 0 : i32
    %c0_i32_0 = arith.constant 0 : i32
    %c0_i32_1 = arith.constant 0 : i32
    return %c0_i32, %c0_i32_0 : i32, i32
  }
  func.func @transform_8(%arg0: i32, %arg1: i32) -> (i32, i32) {
    %c0_i32 = arith.constant 0 : i32
    %c0_i32_0 = arith.constant 0 : i32
    %c0_i32_1 = arith.constant 0 : i32
    return %c0_i32, %c0_i32_0 : i32, i32
  }
  func.func @transform_9(%arg0: i32, %arg1: i32) -> (i32, i32, i32) {
    %c0_i32 = arith.constant 0 : i32
    %c0_i32_0 = arith.constant 0 : i32
    return %arg1, %arg0, %c0_i32 : i32, i32, i32
  }
}

</mosaic_0001>

<bundles_post_ra>
// kernel: tpu_custom_call.1
= control target key start
LH: loop header
LB: loop body
LE: loop exit
PB: predicated region body
PF: predicated region fallthrough
CT: control target
= control target key end

     0   :  { %vm74_vm0 = vcmask 1041408   ;;  %vm61_vm1 = vcmask 31744   ;;  %vm38_vm2 = vcmask 261120   ;;  %v1630_v10 = vmov 0.0   ;;  %s2052_s0 = inlined_call_operand.vmem [shape: f32[8,8,4], index: 0, kind: input, shape index: {}]   ;;  %s2053_s1 = inlined_call_operand.vmem [shape: s32[8,1], index: 1, kind: input, shape index: {}]   ;;  %s2054_s2 = inlined_call_operand.vmem [shape: bf16[4,128], index: 2, kind: input, shape index: {}]   ;;  %s2055_s3 = inlined_call_operand.vmem [shape: bf16[32,128], index: 3, kind: input, shape index: {}]   ;;  %s2056_s4 = inlined_call_operand.vmem [shape: f32[1,128], index: 4, kind: input, shape index: {}]   ;;  %s2057_s5 = inlined_call_operand.vmem [shape: bf16[32,128], index: 5, kind: input, shape index: {}]   ;;  %s2058_s6 = inlined_call_operand.vmem [shape: f32[1,128], index: 6, kind: input, shape index: {}]   ;;  %s2059_s7 = inlined_call_operand.vmem [shape: bf16[128,128], index: 7, kind: input, shape index: {}]   ;;  %s2060_s8 = inlined_call_operand.vmem [shape: f32[1,128], index: 8, kind: input, shape index: {}]   ;;  %s2061_s9 = inlined_call_operand.hbm [shape: f32[8,8,128], index: 9, kind: output, shape index: {}]  }
   0x1   :  { %v53_v0 = vld [vmem:[%s2054_s2] sm:$0x3]  ;;  %v42_v2 = vld [vmem:[%s2052_s0 + $0x8] sm:$0xff]  ;;  %v43_v5 = vld [vmem:[%s2052_s0 + $0x10] sm:$0xff]  ;;  %1428 = vmatprep.subr.bf16.mxu1 %v1630_v10  ;;  %39 = vst.msk [vmem:[#allocation4] sm:$0xff] %vm38_vm2, %v1630_v10  ;;  %vm1631_vm3 = vmmov 0  }
   0x2   :  { %v41_v1 = vld [vmem:[%s2052_s0] sm:$0xff]  ;;  %1504 = vmatprep.subr.msk.bf16.mxu0 %vm74_vm0, %v53_v0  ;;  %v76_v3 = vsel %vm74_vm0, %v53_v0, 0  ;;  %v44_v6 = vld [vmem:[%s2052_s0 + $0x18] sm:$0xff]  ;;  %v46_v11 = vld [vmem:[%s2052_s0 + $0x28] sm:$0xff]  ;;  %40 = vst.msk [vmem:[#allocation5] sm:$0xff] %vm38_vm2, %v1630_v10  ;;  %1432 = vmatprep.mubr.msk.bf16.mxu1 %vm1631_vm3, %v1630_v10 }
   0x3   :  { %v49_v4 = vpack.c.bf16 %v42_v2, %v41_v1  ;;  %1395 = vmatpush3.bf16.msra.mxu0 %v76_v3  ;;  %v50_v7 = vpack.c.bf16 %v44_v6, %v43_v5  ;;  %v1516_v8 = vld [vmem:[%s2055_s3] sm:$0xff]   ;;  %v47_v13 = vld [vmem:[%s2052_s0 + $0x30] sm:$0xff]  ;;  %v48_v14 = vld [vmem:[%s2052_s0 + $0x38] sm:$0xff] }
   0x4   :  { %v45_v9 = vld [vmem:[%s2052_s0 + $0x20] sm:$0xff]  ;;  %1404 = vmatprep.subr.bf16.mxu0 %v1630_v10  ;;  %v1517_v15 = vld [vmem:[%s2055_s3 + $0x8] sm:$0xff]   ;;  %v52_v16 = vpack.c.bf16 %v48_v14, %v47_v13 }
   0x5   :  { %1396 = vmatprep.mubr.msk.bf16.mxu0 %vm61_vm1, %v49_v4  ;;  %v51_v12 = vpack.c.bf16 %v46_v11, %v45_v9 }
   0x6   :  { %1397 = vmatmul.mubr.msk.bf16.vlgmr.msra.gmra.mrb[0].mxu0 %vm61_vm1, %v50_v7 }
   0x7   :  { %1405 = vmatpush3.bf16.msra.mxu0 %v1516_v8  ;;  %1400 = vmatprep.mubr.msk.bf16.mxu0 %vm61_vm1, %v51_v12 }
   0x8   :  { %1406 = vmatprep.subr.bf16.mxu0 %v1630_v10  ;;  %v153_v17 = vld [vmem:[#allocation4] sm:$0xff] }
   0x9   :  { %v156_v18 = vpack.c.bf16 %v153_v17, %v153_v17 }
   0xb   :  { %1407 = vmatpush3.bf16.msra.mxu0 %v1517_v15 }
   0xc   :  { %1412 = vmatprep.subr.bf16.mxu0 %v1630_v10 }
   0xe   :  { %1401 = vmatmul.mubr.msk.bf16.gmra.mrb[4].mxu0 %vm61_vm1, %v52_v16 }
   0xf   :  { %1408 = vmatprep.mubr.msk.bf16.mxu0 %vm1631_vm3, %v1630_v10 }
  0x16   :  { %1409 = vmatmul.mubr.msk.bf16.vlgmr.msra.gmra.mrb[8].mxu0 %vm38_vm2, %v156_v18 }
  0x17   :  { %14 = vsyncpa [#allocation7], 0  ;;  %1416 = vmatprep.mubr.msk.bf16.mxu0 %vm1631_vm3, %v1630_v10  ;;  %v1286_v19 = vld [vmem:[%s2056_s4] ss:$0 sm:$0xff]  ;;  %v1632_v41 = vmov 0   ;;  %s1633_s4 = smov 32  }
  0x18   :  { %1514 = vset.pattern.permute.xlu1 %v1632_v41  ;;  %1515 = vset.pattern.permute.xlu0 %v1632_v41  ;;  %v154_v43 = vld [vmem:[#allocation5] sm:$0xff]  ;;  %v1765_v47 = vld [vmem:[%s2053_s1] sm:$0xff]  ;;  %s1634_s12 = smov 64   ;;  %s1635_s23 = smov 96  }
  0x19   :  { %vm1295_vm4 = vcmp.gt.s32.totalorder %v1765_v47, 0  ;;  %v1518_v56 = vld [vmem:[%s2055_s3] sm:$0xff]   ;;  %v1519_v57 = vld [vmem:[%s2055_s3 + $0x8] sm:$0xff]   ;;  %vm1300_vm6 = vcmp.gt.s32.totalorder %v1765_v47, 1  ;;  %vm1305_vm8 = vcmp.gt.s32.totalorder %v1765_v47, 2  ;;  %vm1310_vm10 = vcmp.gt.s32.totalorder %v1765_v47, 3 }
  0x1a   :  { %v248_v51 = vsel %vm1295_vm4, 1, %v1632_v41  ;;  %1413 = vmatpush3.bf16.msra.mxu0 %v1518_v56  ;;  %v357_v8 = vsel %vm1300_vm6, 1, %v1632_v41  ;;  %vm1315_vm12 = vcmp.gt.s32.totalorder %v1765_v47, 4  ;;  %vm1320_vm14 = vcmp.gt.s32.totalorder %v1765_v47, 5  ;;  %s1636_s13 = smov [#allocation6]  }
  0x1b   :  { %1414 = vmatprep.subr.bf16.mxu0 %v1630_v10  ;;  %vm1325_vm0 = vcmp.gt.s32.totalorder %v1765_v47, 6  ;;  %s1275_s14 = sshll.u32 %s1636_s13, 4  ;;  %s1276_s14 = int_to_ptr.vmem [resolvable:$true] %s1275_s14 }
  0x1c   :  { %p1611_p1 = scmp.lt.s32.totalorder %s1276_s14, %s1276_s14 }
  0x1e   :  { %1415 = vmatpush3.bf16.msra.mxu0 %v1519_v57 }
  0x1f   :  { %1420 = vmatprep.subr.bf16.mxu0 %v1630_v10 }
  0xd9   :  { %v1398_v20 = vpop.f32.mrb[0].mxu0 }
  0xda   :  { %v1744_v21 = vadd.f32 %v1398_v20, %v1286_v19  ;;  %v112_v22 = vpop.f32.mrb[1].mxu0  ;;  %v1520_v20 = vld [vmem:[%s2055_s3] sm:$0xff]  }
  0xdb   :  { %v1399_v23 = vpop.f32.mrb[2].mxu0  ;;  %v113_v35 = vadd.f32 %v1286_v19, %v112_v22  ;;  %v1521_v22 = vld [vmem:[%s2055_s3 + $0x8] sm:$0xff]  }
  0xdc   :  { %v1746_v24 = vadd.f32 %v1399_v23, %v1286_v19  ;;  %v115_v25 = vpop.f32.mrb[3].mxu0 }
  0xdd   :  { %v1748_v26 = vadd.f32 %v1286_v19, %v115_v25 }
  0xe1   :  { %v1402_v27 = vpop.f32.mrb[4].mxu0 }
  0xe2   :  { %v1750_v28 = vadd.f32 %v1402_v27, %v1286_v19  ;;  %v128_v29 = vpop.f32.mrb[5].mxu0 }
  0xe3   :  { %v1752_v30 = vadd.f32 %v1286_v19, %v128_v29  ;;  %v1403_v31 = vpop.f32.mrb[6].mxu0 }
  0xe4   :  { %v1754_v32 = vadd.f32 %v1403_v31, %v1286_v19  ;;  %v131_v33 = vpop.f32.mrb[7].mxu0 }
  0xe5   :  { %v1756_v34 = vadd.f32 %v1286_v19, %v131_v33 }
  0xe9   :  { %v211_v36 = vpop.f32.mrb[8].mxu0 }
  0xea   :  { %v217_v37 = vadd.f32 %v211_v36, %v113_v35  ;;  %v1410_v38 = vpop.f32.mrb[9].mxu0 }
  0xeb   :  { %v214_v39 = vpop.f32.mrb[10].mxu0 }
  0xec   :  { %1542 = vtanh.f32 %v217_v37  ;;  %v1411_v40 = vpop.f32.mrb[11].mxu0  ;;  %v1294_v44 = vmul.f32 -1.442695, %v217_v37 }
  0xee   :  { %1544 = vpow2.f32 %v1294_v44 }
  0xf6   :  { %v1543_v42 = vpop.eup %1542 }
  0xf7   :  { %231 = vrot.lane.b32.xlu0 %v1543_v42, %s1633_s4  ;;  %v462_v42 = vsel %vm1305_vm8, 1, %v1632_v41 }
  0xf8   :  { %v1545_v45 = vpop.eup %1544 }
  0xf9   :  { %v221_v46 = vadd.f32 1.0, %v1545_v45 }
  0xfb   :  { %226 = vrot.lane.b32.xlu0 %v154_v43, %s1633_s4  ;;  %1546 = vrcp.f32 %v221_v46 }
 0x105   :  { %v1547_v48 = vpop.eup %1546 }
 0x169   :  { %v232_v49 = vpop.permute.xlu0 %231 }
 0x16a   :  { %v234_v50 = vmul.f32 %v1547_v48, %v232_v49 }
 0x16c   :  { %236 = vrot.lane.b32.xlu1 %v234_v50, %s1633_s4 }
 0x16d   :  { %v227_v52 = vpop.permute.xlu0 %226 }
 0x16e   :  { %v229_v53 = vmul.f32 %v1547_v48, %v227_v52 }
 0x170   :  { %250 = vperm.xlu1 %1514, %v248_v51  }
 0x174   :  { %254 = vrot.lane.b32.xlu1 %v153_v17, %s1634_s12 }
 0x1de   :  { %v237_v54 = vpop.permute.xlu1 %236 }
 0x1df   :  { %v239_v55 = vadd.f32 %v237_v54, %v229_v53  ;;  %v1522_v53 = vld [vmem:[%s2055_s3] sm:$0xff]   ;;  %v1523_v54 = vld [vmem:[%s2055_s3 + $0x8] sm:$0xff]  }
 0x1e0   :  { %1429 = vmatpush3.bf16.msra.mxu1 %v1522_v53 }
 0x1e1   :  { %1548 = vtanh.f32 %v239_v55  ;;  %1430 = vmatprep.subr.bf16.mxu1 %v1630_v10 }
 0x1e4   :  { %1431 = vmatpush3.bf16.msra.mxu1 %v1523_v54 }
 0x1e5   :  { %1444 = vmatprep.subr.bf16.mxu1 %v1630_v10 }
 0x1eb   :  { %v1549_v58 = vpop.eup %1548 }
 0x1ec   :  { %242 = vrot.lane.b32.xlu0 %v1549_v58, %s1633_s4 }
 0x1ef   :  { %v1780_v59 = vpop.permute.xlu1 %250 }
 0x1f0   :  { %vm252_vm5 = vcmp.eq.s32.totalorder %v1780_v59, 1 }
 0x1f1   :  { %v258_v16 = vsel %vm252_vm5, %v239_v55, %v227_v52 }
 0x1f3   :  { %v255_v61 = vpop.permute.xlu1 %254 }
 0x25e   :  { %v243_v60 = vpop.permute.xlu0 %242 }
 0x25f   :  { %v1782_v62 = vmul.f32 %v1547_v48, %v243_v60 }
 0x261   :  { %v257_v63 = vsel %vm252_vm5, %v1782_v62, %v255_v61 }
 0x262   :  { %v266_v0 = vpack.c.bf16 %v257_v63, %v257_v63 }
 0x264   :  { %272 = vrot.lane.b32.xlu0 %v266_v0, %s1634_s12 }
 0x2d6   :  { %v273_v1 = vpop.permute.xlu0 %272 }
 0x2d7   :  { %1417 = vmatmul.mubr.msk.bf16.vlgmr.msra.gmra.mrb[12].mxu0 %vm38_vm2, %v273_v1 }
 0x2d8   :  { %1424 = vmatprep.mubr.msk.bf16.mxu0 %vm1631_vm3, %v1630_v10  ;;  %1421 = vmatpush3.bf16.msra.mxu0 %v1520_v20 }
 0x2d9   :  { %1422 = vmatprep.subr.bf16.mxu0 %v1630_v10 }
 0x2dc   :  { %1423 = vmatpush3.bf16.msra.mxu0 %v1521_v22 }
 0x2dd   :  { %1436 = vmatprep.subr.bf16.mxu0 %v1630_v10 }
 0x3aa   :  { %v323_v2 = vpop.f32.mrb[12].mxu0 }
 0x3ab   :  { %v329_v3 = vadd.f32 %v323_v2, %v1748_v26  ;;  %v1418_v4 = vpop.f32.mrb[13].mxu0 }
 0x3ac   :  { %v326_v5 = vpop.f32.mrb[14].mxu0 }
 0x3ad   :  { %1550 = vtanh.f32 %v329_v3  ;;  %v1419_v6 = vpop.f32.mrb[15].mxu0  ;;  %v1299_v9 = vmul.f32 -1.442695, %v329_v3 }
 0x3ae   :  { %v567_v6 = vsel %vm1310_vm10, 1, %v1632_v41 }
 0x3af   :  { %1552 = vpow2.f32 %v1299_v9 }
 0x3b7   :  { %v1551_v7 = vpop.eup %1550 }
 0x3b8   :  { %339 = vrot.lane.b32.xlu1 %v1551_v7, %s1633_s4 }
 0x3b9   :  { %v1553_v11 = vpop.eup %1552 }
 0x3ba   :  { %v333_v12 = vadd.f32 1.0, %v1553_v11 }
 0x3bc   :  { %359 = vperm.xlu1 %1514, %v357_v8   ;;  %1554 = vrcp.f32 %v333_v12 }
 0x3c6   :  { %v1555_v13 = vpop.eup %1554 }
 0x3c7   :  { %v337_v17 = vmul.f32 %v1555_v13, %v258_v16 }
 0x42a   :  { %v340_v14 = vpop.permute.xlu1 %339 }
 0x42b   :  { %v342_v15 = vmul.f32 %v1555_v13, %v340_v14 }
 0x42d   :  { %344 = vrot.lane.b32.xlu0 %v342_v15, %s1633_s4 }
 0x43b   :  { %v1808_v25 = vpop.permute.xlu1 %359 }
 0x43c   :  { %vm361_vm7 = vcmp.eq.s32.totalorder %v1808_v25, 1  ;;  %v1534_v25 = vld [vmem:[%s2059_s7] sm:$0xff]  }
 0x49f   :  { %v345_v18 = vpop.permute.xlu0 %344 }
 0x4a0   :  { %v347_v19 = vadd.f32 %v345_v18, %v337_v17  ;;  %v1524_v17 = vld [vmem:[%s2055_s3] sm:$0xff]   ;;  %v1525_v18 = vld [vmem:[%s2055_s3 + $0x8] sm:$0xff]  }
 0x4a2   :  { %1556 = vtanh.f32 %v347_v19  ;;  %v363_v49 = vsel %vm361_vm7, %v347_v19, %v258_v16 }
 0x4ac   :  { %v1557_v23 = vpop.eup %1556 }
 0x4ad   :  { %350 = vrot.lane.b32.xlu0 %v1557_v23, %s1633_s4 }
 0x51f   :  { %v351_v26 = vpop.permute.xlu0 %350 }
 0x520   :  { %v1810_v27 = vmul.f32 %v1555_v13, %v351_v26 }
 0x522   :  { %v362_v29 = vsel %vm361_vm7, %v1810_v27, %v257_v63 }
 0x523   :  { %v371_v31 = vpack.c.bf16 %v362_v29, %v362_v29 }
 0x525   :  { %377 = vrot.lane.b32.xlu1 %v371_v31, %s1634_s12 }
 0x597   :  { %v378_v33 = vpop.permute.xlu1 %377 }
 0x598   :  { %1425 = vmatmul.mubr.msk.bf16.vlgmr.msra.gmra.mrb[16].mxu0 %vm38_vm2, %v378_v33 }
 0x599   :  { %1440 = vmatprep.mubr.msk.bf16.mxu0 %vm1631_vm3, %v1630_v10  ;;  %1437 = vmatpush3.bf16.msra.mxu0 %v1524_v17  ;;  %v1529_v17 = vld [vmem:[%s2055_s3 + $0x8] sm:$0xff]  }
 0x59a   :  { %1438 = vmatprep.subr.bf16.mxu0 %v1630_v10 }
 0x59d   :  { %1439 = vmatpush3.bf16.msra.mxu0 %v1525_v18 }
 0x59e   :  { %1452 = vmatprep.subr.bf16.mxu0 %v1630_v10 }
 0x66b   :  { %v428_v35 = vpop.f32.mrb[16].mxu0 }
 0x66c   :  { %v434_v36 = vadd.f32 %v428_v35, %v1744_v21  ;;  %v1426_v37 = vpop.f32.mrb[17].mxu0 }
 0x66d   :  { %v431_v38 = vpop.f32.mrb[18].mxu0 }
 0x66e   :  { %1558 = vtanh.f32 %v434_v36  ;;  %v1427_v39 = vpop.f32.mrb[19].mxu0  ;;  %v1304_v43 = vmul.f32 -1.442695, %v434_v36 }
 0x670   :  { %1560 = vpow2.f32 %v1304_v43 }
 0x678   :  { %v1559_v40 = vpop.eup %1558 }
 0x679   :  { %444 = vrot.lane.b32.xlu0 %v1559_v40, %s1633_s4  ;;  %v672_v40 = vsel %vm1315_vm12, 1, %v1632_v41 }
 0x67a   :  { %v1561_v44 = vpop.eup %1560 }
 0x67b   :  { %v438_v45 = vadd.f32 1.0, %v1561_v44 }
 0x67d   :  { %464 = vperm.xlu0 %1515, %v462_v42   ;;  %1562 = vrcp.f32 %v438_v45 }
 0x687   :  { %v1563_v46 = vpop.eup %1562 }
 0x688   :  { %v442_v50 = vmul.f32 %v1563_v46, %v363_v49 }
 0x6eb   :  { %v445_v48 = vpop.permute.xlu0 %444 }
 0x6ec   :  { %v447_v21 = vmul.f32 %v1563_v46, %v445_v48 }
 0x6ee   :  { %449 = vrot.lane.b32.xlu1 %v447_v21, %s1633_s4 }
 0x6fc   :  { %v1836_v56 = vpop.permute.xlu0 %464 }
 0x6fd   :  { %vm466_vm9 = vcmp.eq.s32.totalorder %v1836_v56, 1 }
 0x760   :  { %v450_v51 = vpop.permute.xlu1 %449 }
 0x761   :  { %v452_v52 = vadd.f32 %v450_v51, %v442_v50  ;;  %v1526_v51 = vld [vmem:[%s2055_s3] sm:$0xff]  }
 0x763   :  { %1564 = vtanh.f32 %v452_v52  ;;  %v468_v13 = vsel %vm466_vm9, %v452_v52, %v363_v49  ;;  %v1527_v52 = vld [vmem:[%s2055_s3 + $0x8] sm:$0xff]  }
 0x76d   :  { %v1565_v55 = vpop.eup %1564 }
 0x76e   :  { %455 = vrot.lane.b32.xlu1 %v1565_v55, %s1633_s4 }
 0x7e0   :  { %v456_v57 = vpop.permute.xlu1 %455 }
 0x7e1   :  { %v1838_v58 = vmul.f32 %v1563_v46, %v456_v57 }
 0x7e3   :  { %v467_v60 = vsel %vm466_vm9, %v1838_v58, %v362_v29 }
 0x7e4   :  { %v476_v61 = vpack.c.bf16 %v467_v60, %v467_v60 }
 0x7e6   :  { %482 = vrot.lane.b32.xlu1 %v476_v61, %s1634_s12 }
 0x858   :  { %v483_v63 = vpop.permute.xlu1 %482 }
 0x859   :  { %1433 = vmatmul.mubr.msk.bf16.vlgmr.msra.gmra.mrb[0].mxu1 %vm38_vm2, %v483_v63 }
 0x85a   :  { %1448 = vmatprep.mubr.msk.bf16.mxu1 %vm1631_vm3, %v1630_v10  ;;  %1445 = vmatpush3.bf16.msra.mxu1 %v1526_v51  ;;  %v1530_v51 = vld [vmem:[%s2055_s3] sm:$0xff]  }
 0x85b   :  { %1446 = vmatprep.subr.bf16.mxu1 %v1630_v10 }
 0x85e   :  { %1447 = vmatpush3.bf16.msra.mxu1 %v1527_v52  ;;  %v1531_v52 = vld [vmem:[%s2055_s3 + $0x8] sm:$0xff]  }
 0x85f   :  { %1460 = vmatprep.subr.bf16.mxu1 %v1630_v10 }
 0x92c   :  { %v533_v0 = vpop.f32.mrb[0].mxu1 }
 0x92d   :  { %v539_v1 = vadd.f32 %v533_v0, %v1746_v24  ;;  %v1434_v2 = vpop.f32.mrb[1].mxu1 }
 0x92e   :  { %v536_v3 = vpop.f32.mrb[2].mxu1 }
 0x92f   :  { %1566 = vtanh.f32 %v539_v1  ;;  %v1435_v4 = vpop.f32.mrb[3].mxu1  ;;  %v1309_v7 = vmul.f32 -1.442695, %v539_v1 }
 0x931   :  { %1568 = vpow2.f32 %v1309_v7 }
 0x939   :  { %v1567_v5 = vpop.eup %1566 }
 0x93a   :  { %549 = vrot.lane.b32.xlu0 %v1567_v5, %s1633_s4 }
 0x93b   :  { %v1569_v8 = vpop.eup %1568 }
 0x93c   :  { %v543_v9 = vadd.f32 1.0, %v1569_v8 }
 0x93e   :  { %569 = vperm.xlu0 %1515, %v567_v6   ;;  %1570 = vrcp.f32 %v543_v9  ;;  %v777_v6 = vsel %vm1320_vm14, 1, %v1632_v41 }
 0x948   :  { %v1571_v11 = vpop.eup %1570 }
 0x949   :  { %v547_v14 = vmul.f32 %v1571_v11, %v468_v13 }
 0x9ac   :  { %v550_v12 = vpop.permute.xlu0 %549 }
 0x9ad   :  { %v552_v24 = vmul.f32 %v1571_v11, %v550_v12 }
 0x9af   :  { %554 = vrot.lane.b32.xlu1 %v552_v24, %s1633_s4 }
 0x9bd   :  { %v1864_v20 = vpop.permute.xlu0 %569 }
 0x9be   :  { %vm571_vm11 = vcmp.eq.s32.totalorder %v1864_v20, 1 }
 0xa21   :  { %v555_v15 = vpop.permute.xlu1 %554 }
 0xa22   :  { %v557_v16 = vadd.f32 %v555_v15, %v547_v14 }
 0xa24   :  { %1572 = vtanh.f32 %v557_v16  ;;  %v573_v48 = vsel %vm571_vm11, %v557_v16, %v468_v13  ;;  %v1528_v16 = vld [vmem:[%s2055_s3] sm:$0xff]  }
 0xa2e   :  { %v1573_v19 = vpop.eup %1572 }
 0xa2f   :  { %560 = vrot.lane.b32.xlu1 %v1573_v19, %s1633_s4 }
 0xaa1   :  { %v561_v22 = vpop.permute.xlu1 %560 }
 0xaa2   :  { %v1866_v23 = vmul.f32 %v1571_v11, %v561_v22 }
 0xaa4   :  { %v572_v26 = vsel %vm571_vm11, %v1866_v23, %v467_v60 }
 0xaa5   :  { %v581_v29 = vpack.c.bf16 %v572_v26, %v572_v26 }
 0xaa7   :  { %587 = vrot.lane.b32.xlu0 %v581_v29, %s1634_s12 }
 0xb19   :  { %v588_v31 = vpop.permute.xlu0 %587 }
 0xb1a   :  { %1441 = vmatmul.mubr.msk.bf16.vlgmr.msra.gmra.mrb[20].mxu0 %vm38_vm2, %v588_v31 }
 0xb1b   :  { %1456 = vmatprep.mubr.msk.bf16.mxu0 %vm1631_vm3, %v1630_v10  ;;  %1453 = vmatpush3.bf16.msra.mxu0 %v1528_v16 }
 0xb1c   :  { %1454 = vmatprep.subr.bf16.mxu0 %v1630_v10 }
 0xb1f   :  { %1455 = vmatpush3.bf16.msra.mxu0 %v1529_v17 }
 0xbed   :  { %v638_v33 = vpop.f32.mrb[20].mxu0 }
 0xbee   :  { %v644_v35 = vadd.f32 %v638_v33, %v1752_v30  ;;  %v1442_v36 = vpop.f32.mrb[21].mxu0 }
 0xbef   :  { %v641_v37 = vpop.f32.mrb[22].mxu0 }
 0xbf0   :  { %1574 = vtanh.f32 %v644_v35  ;;  %v1443_v38 = vpop.f32.mrb[23].mxu0  ;;  %v1314_v42 = vmul.f32 -1.442695, %v644_v35 }
 0xbf2   :  { %1576 = vpow2.f32 %v1314_v42  ;;  %v882_v42 = vsel %vm1325_vm0, 1, %v1632_v41 }
 0xbfa   :  { %v1575_v39 = vpop.eup %1574 }
 0xbfb   :  { %654 = vrot.lane.b32.xlu1 %v1575_v39, %s1633_s4 }
 0xbfc   :  { %v1577_v43 = vpop.eup %1576 }
 0xbfd   :  { %v648_v44 = vadd.f32 1.0, %v1577_v43 }
 0xbff   :  { %674 = vperm.xlu1 %1514, %v672_v40   ;;  %1578 = vrcp.f32 %v648_v44 }
 0xc09   :  { %v1579_v45 = vpop.eup %1578 }
 0xc0a   :  { %v652_v21 = vmul.f32 %v1579_v45, %v573_v48 }
 0xc6d   :  { %v655_v46 = vpop.permute.xlu1 %654 }
 0xc6e   :  { %v657_v30 = vmul.f32 %v1579_v45, %v655_v46 }
 0xc70   :  { %659 = vrot.lane.b32.xlu0 %v657_v30, %s1633_s4 }
 0xc7e   :  { %v1892_v54 = vpop.permute.xlu1 %674 }
 0xc7f   :  { %vm676_vm13 = vcmp.eq.s32.totalorder %v1892_v54, 1 }
 0xce2   :  { %v660_v49 = vpop.permute.xlu0 %659 }
 0xce3   :  { %v662_v50 = vadd.f32 %v660_v49, %v652_v21 }
 0xce5   :  { %1580 = vtanh.f32 %v662_v50  ;;  %v678_v24 = vsel %vm676_vm13, %v662_v50, %v573_v48 }
 0xcef   :  { %v1581_v53 = vpop.eup %1580 }
 0xcf0   :  { %665 = vrot.lane.b32.xlu0 %v1581_v53, %s1633_s4 }
 0xd62   :  { %v666_v55 = vpop.permute.xlu0 %665 }
 0xd63   :  { %v1894_v57 = vmul.f32 %v1579_v45, %v666_v55 }
 0xd65   :  { %v677_v60 = vsel %vm676_vm13, %v1894_v57, %v572_v26 }
 0xd66   :  { %v686_v61 = vpack.c.bf16 %v677_v60, %v677_v60 }
 0xd68   :  { %692 = vrot.lane.b32.xlu1 %v686_v61, %s1634_s12 }
 0xdda   :  { %v693_v63 = vpop.permute.xlu1 %692 }
 0xddb   :  { %1449 = vmatmul.mubr.msk.bf16.vlgmr.msra.gmra.mrb[4].mxu1 %vm38_vm2, %v693_v63 }
 0xddc   :  { %1464 = vmatprep.mubr.msk.bf16.mxu1 %vm1631_vm3, %v1630_v10  ;;  %1461 = vmatpush3.bf16.msra.mxu1 %v1530_v51  ;;  %vm1330_vm3 = vcmp.gt.s32.totalorder %v1765_v47, 7  ;;  %v679_v47 = vsel %vm676_vm13, %v1894_v57, 0.0  ;;  %v1540_v51 = vld [vmem:[%s2059_s7 + $0x30] sm:$0xff]  }
 0xddd   :  { %1462 = vmatprep.subr.bf16.mxu1 %v1630_v10 }
 0xde0   :  { %1463 = vmatpush3.bf16.msra.mxu1 %v1531_v52  ;;  %v1541_v52 = vld [vmem:[%s2059_s7 + $0x38] sm:$0xff]  }
 0xde1   :  { %1480 = vmatprep.subr.bf16.mxu1 %v1534_v25 }
 0xeae   :  { %v743_v0 = vpop.f32.mrb[4].mxu1 }
 0xeaf   :  { %v749_v1 = vadd.f32 %v743_v0, %v1756_v34  ;;  %v1450_v2 = vpop.f32.mrb[5].mxu1 }
 0xeb0   :  { %v746_v3 = vpop.f32.mrb[6].mxu1 }
 0xeb1   :  { %1582 = vtanh.f32 %v749_v1  ;;  %v1451_v4 = vpop.f32.mrb[7].mxu1  ;;  %v1319_v7 = vmul.f32 -1.442695, %v749_v1 }
 0xeb3   :  { %1584 = vpow2.f32 %v1319_v7  ;;  %v987_v7 = vsel %vm1330_vm3, 1, %v1632_v41 }
 0xebb   :  { %v1583_v5 = vpop.eup %1582 }
 0xebc   :  { %759 = vrot.lane.b32.xlu0 %v1583_v5, %s1633_s4 }
 0xebd   :  { %v1585_v8 = vpop.eup %1584 }
 0xebe   :  { %v753_v9 = vadd.f32 1.0, %v1585_v8  ;;  %v259_v8 = vsel %vm252_vm5, %v1782_v62, 0.0 }
 0xec0   :  { %779 = vperm.xlu0 %1515, %v777_v6   ;;  %1586 = vrcp.f32 %v753_v9 }
 0xeca   :  { %v1587_v11 = vpop.eup %1586 }
 0xecb   :  { %v757_v13 = vmul.f32 %v1587_v11, %v678_v24 }
 0xf2e   :  { %v760_v12 = vpop.permute.xlu0 %759 }
 0xf2f   :  { %v762_v34 = vmul.f32 %v1587_v11, %v760_v12 }
 0xf31   :  { %764 = vrot.lane.b32.xlu1 %v762_v34, %s1633_s4 }
 0xf3f   :  { %v1919_v19 = vpop.permute.xlu0 %779 }
 0xf40   :  { %vm781_vm15 = vcmp.eq.s32.totalorder %v1919_v19, 1 }
 0xfa3   :  { %v765_v14 = vpop.permute.xlu1 %764 }
 0xfa4   :  { %v767_v15 = vadd.f32 %v765_v14, %v757_v13 }
 0xfa6   :  { %1588 = vtanh.f32 %v767_v15  ;;  %v783_v48 = vsel %vm781_vm15, %v767_v15, %v678_v24 }
 0xfb0   :  { %v1589_v18 = vpop.eup %1588 }
 0xfb1   :  { %770 = vrot.lane.b32.xlu1 %v1589_v18, %s1633_s4  ;;  %v1532_v18 = vld [vmem:[%s2057_s5] sm:$0xff]  }
 0xfb2   :  { %1468 = vmatprep.subr.bf16.mxu0 %v1532_v18 }
0x1023   :  { %v771_v22 = vpop.permute.xlu1 %770 }
0x1024   :  { %v1921_v26 = vmul.f32 %v1587_v11, %v771_v22 }
0x1026   :  { %v782_v29 = vsel %vm781_vm15, %v1921_v26, %v677_v60 }
0x1027   :  { %v791_v31 = vpack.c.bf16 %v782_v29, %v782_v29 }
0x1029   :  { %797 = vrot.lane.b32.xlu0 %v791_v31, %s1634_s12  ;;  %v364_v31 = vsel %vm361_vm7, %v1810_v27, 0.0  ;;  %v1535_v27 = vld [vmem:[%s2059_s7 + $0x8] sm:$0xff]  }
0x109b   :  { %v798_v33 = vpop.permute.xlu0 %797 }
0x109c   :  { %1457 = vmatmul.mubr.msk.bf16.vlgmr.msra.gmra.mrb[24].mxu0 %vm38_vm2, %v798_v33  ;;  %v574_v33 = vsel %vm571_vm11, %v1866_v23, 0.0 }
0x109d   :  { %1469 = vmatpush3.bf16.msra.mxu0 %v1532_v18 }
0x116f   :  { %v848_v35 = vpop.f32.mrb[24].mxu0 }
0x1170   :  { %v854_v36 = vadd.f32 %v848_v35, %v1750_v28  ;;  %v1458_v37 = vpop.f32.mrb[25].mxu0  ;;  %v784_v35 = vsel %vm781_vm15, %v1921_v26, 0.0  ;;  %v1536_v26 = vld [vmem:[%s2059_s7 + $0x10] sm:$0xff]  }
0x1171   :  { %v851_v38 = vpop.f32.mrb[26].mxu0 }
0x1172   :  { %1590 = vtanh.f32 %v854_v36  ;;  %v1459_v39 = vpop.f32.mrb[27].mxu0  ;;  %v1324_v43 = vmul.f32 -1.442695, %v854_v36 }
0x1173   :  { %v1537_v39 = vld [vmem:[%s2059_s7 + $0x18] sm:$0xff]  }
0x1174   :  { %1592 = vpow2.f32 %v1324_v43 }
0x117c   :  { %v1591_v40 = vpop.eup %1590 }
0x117d   :  { %864 = vrot.lane.b32.xlu1 %v1591_v40, %s1633_s4 }
0x117e   :  { %v1593_v44 = vpop.eup %1592 }
0x117f   :  { %v858_v45 = vadd.f32 1.0, %v1593_v44 }
0x1181   :  { %884 = vperm.xlu1 %1514, %v882_v42   ;;  %1594 = vrcp.f32 %v858_v45  ;;  %v1538_v45 = vld [vmem:[%s2059_s7 + $0x20] sm:$0xff]  }
0x118b   :  { %v1595_v46 = vpop.eup %1594 }
0x118c   :  { %v862_v21 = vmul.f32 %v1595_v46, %v783_v48 }
0x11ef   :  { %v865_v30 = vpop.permute.xlu1 %864 }
0x11f0   :  { %v867_v28 = vmul.f32 %v1595_v46, %v865_v30 }
0x11f2   :  { %869 = vrot.lane.b32.xlu0 %v867_v28, %s1633_s4 }
0x1200   :  { %v885_v55 = vpop.permute.xlu1 %884 }
0x1201   :  { %vm886_vm1 = vcmp.eq.s32.totalorder %v885_v55, 1 }
0x1264   :  { %v870_v49 = vpop.permute.xlu0 %869 }
0x1265   :  { %v872_v50 = vadd.f32 %v870_v49, %v862_v21 }
0x1267   :  { %1596 = vtanh.f32 %v872_v50  ;;  %v888_v13 = vsel %vm886_vm1, %v872_v50, %v783_v48  ;;  %v1539_v48 = vld [vmem:[%s2059_s7 + $0x28] sm:$0xff]  }
0x1271   :  { %v1597_v53 = vpop.eup %1596 }
0x1272   :  { %875 = vrot.lane.b32.xlu0 %v1597_v53, %s1633_s4 }
0x12e4   :  { %v876_v60 = vpop.permute.xlu0 %875 }
0x12e5   :  { %v878_v61 = vmul.f32 %v1595_v46, %v876_v60 }
0x12e7   :  { %v1945_v63 = vsel %vm886_vm1, %v878_v61, %v782_v29  ;;  %v889_v41 = vsel %vm886_vm1, %v878_v61, 0.0  ;;  %v1533_v29 = vld [vmem:[%s2057_s5 + $0x8] sm:$0xff]  }
0x12e8   :  { %v896_v0 = vpack.c.bf16 %v1945_v63, %v1945_v63  ;;  %1470 = vmatprep.subr.bf16.mxu0 %v1533_v29 }
0x12e9   :  { %1471 = vmatpush3.bf16.msra.mxu0 %v1533_v29 }
0x12ea   :  { %902 = vrot.lane.b32.xlu1 %v896_v0, %s1634_s12 }
0x135c   :  { %v903_v1 = vpop.permute.xlu1 %902 }
0x135d   :  { %1465 = vmatmul.mubr.msk.bf16.vlgmr.msra.gmra.mrb[8].mxu1 %vm38_vm2, %v903_v1 }
0x135e   :  { %1481 = vmatpush3.bf16.msra.mxu1 %v1534_v25 }
0x135f   :  { %1482 = vmatprep.subr.bf16.mxu1 %v1535_v27 }
0x1362   :  { %1483 = vmatpush3.bf16.msra.mxu1 %v1535_v27 }
0x1363   :  { %1484 = vmatprep.subr.bf16.mxu1 %v1536_v26 }
0x1366   :  { %1485 = vmatpush3.bf16.msra.mxu1 %v1536_v26 }
0x1367   :  { %1486 = vmatprep.subr.bf16.mxu1 %v1537_v39 }
0x136a   :  { %1487 = vmatpush3.bf16.msra.mxu1 %v1537_v39 }
0x136b   :  { %1488 = vmatprep.subr.bf16.mxu1 %v1538_v45 }
0x136e   :  { %1489 = vmatpush3.bf16.msra.mxu1 %v1538_v45 }
0x136f   :  { %1490 = vmatprep.subr.bf16.mxu1 %v1539_v48 }
0x1372   :  { %1491 = vmatpush3.bf16.msra.mxu1 %v1539_v48 }
0x1373   :  { %1492 = vmatprep.subr.bf16.mxu1 %v1540_v51 }
0x1376   :  { %1493 = vmatpush3.bf16.msra.mxu1 %v1540_v51 }
0x1377   :  { %1494 = vmatprep.subr.bf16.mxu1 %v1541_v52 }
0x137a   :  { %1495 = vmatpush3.bf16.msra.mxu1 %v1541_v52 }
0x1430   :  { %v953_v10 = vpop.f32.mrb[8].mxu1 }
0x1431   :  { %v959_v2 = vadd.f32 %v953_v10, %v1754_v32  ;;  %v1466_v3 = vpop.f32.mrb[9].mxu1  ;;  %v469_v32 = vsel %vm466_vm9, %v1838_v58, 0.0  ;;  %v1331_v10 = vld [vmem:[%s2058_s6] ss:$0 sm:$0xff] }
0x1432   :  { %v956_v4 = vpop.f32.mrb[10].mxu1 }
0x1433   :  { %1598 = vtanh.f32 %v959_v2  ;;  %v1467_v5 = vpop.f32.mrb[11].mxu1  ;;  %v1329_v59 = vmul.f32 -1.442695, %v959_v2 }
0x1435   :  { %1600 = vpow2.f32 %v1329_v59 }
0x143d   :  { %v1599_v6 = vpop.eup %1598 }
0x143e   :  { %969 = vrot.lane.b32.xlu0 %v1599_v6, %s1633_s4 }
0x143f   :  { %v1601_v62 = vpop.eup %1600 }
0x1440   :  { %v963_v9 = vadd.f32 1.0, %v1601_v62 }
0x1442   :  { %989 = vperm.xlu0 %1515, %v987_v7   ;;  %1602 = vrcp.f32 %v963_v9 }
0x1446   :  { %261 = vrot.lane.b32.xlu0 %v259_v8, %s1634_s12 }
0x144a   :  { %471 = vrot.lane.b32.xlu0 %v469_v32, %s1634_s12 }
0x144c   :  { %v1603_v11 = vpop.eup %1602 }
0x144d   :  { %v967_v14 = vmul.f32 %v1603_v11, %v888_v13 }
0x144e   :  { %681 = vrot.lane.b32.xlu0 %v679_v47, %s1634_s12 }
0x1452   :  { %891 = vrot.lane.b32.xlu0 %v889_v41, %s1634_s12 }
0x14b0   :  { %v970_v56 = vpop.permute.xlu0 %969 }
0x14b1   :  { %v972_v58 = vmul.f32 %v1603_v11, %v970_v56 }
0x14b3   :  { %974 = vrot.lane.b32.xlu1 %v972_v58, %s1633_s4 }
0x14c1   :  { %v990_v12 = vpop.permute.xlu0 %989 }
0x14c2   :  { %vm991_vm4 = vcmp.eq.s32.totalorder %v990_v12, 1 }
0x14c5   :  { %v262_v34 = vpop.permute.xlu0 %261 }
0x14c6   :  { %264 = vst.msk [vmem:[#allocation3] sm:$0xff] %vm38_vm2, %v262_v34 }
0x14c9   :  { %v472_v54 = vpop.permute.xlu0 %471 }
0x14ca   :  { %474 = vst.msk [vmem:[#allocation3 + $0x10] sm:$0xff] %vm38_vm2, %v472_v54 }
0x14cd   :  { %v682_v57 = vpop.permute.xlu0 %681  ;;  %v1010_v42 = vld [vmem:[#allocation3] sm:$0xff] }
0x14ce   :  { %684 = vst.msk [vmem:[#allocation3 + $0x20] sm:$0xff] %vm38_vm2, %v682_v57  ;;  %v1338_v57 = vld [vmem:[%s2060_s8] ss:$0 sm:$0xff]  ;;  %s1606_s8 = scalar_lea.vmem %s1276_s14, 1024 }
0x14cf   :  { %p1607_p0 = scmp.ne.s32.totalorder %s1276_s14, %s1606_s8  ;;  %p1612_p2 = scmp.lt.s32.totalorder %s1606_s8, %s1606_s8 }
0x14d1   :  { %v892_v24 = vpop.permute.xlu0 %891  ;;  %v1012_v46 = vld [vmem:[#allocation3 + $0x10] sm:$0xff]  ;;  %p1613_p3 = por %p1612_p2, %p1611_p1 }
0x14d2   :  { %894 = vst.msk [vmem:[#allocation3 + $0x30] sm:$0xff] %vm38_vm2, %v892_v24 }
0x14d3   :  { %p1614_p4 = pnand %p1613_p3, %p1607_p0 }
0x14d5   :  { %v1014_v21 = vld [vmem:[#allocation3 + $0x20] sm:$0xff] }
0x14d9   :  { %v1016_v61 = vld [vmem:[#allocation3 + $0x30] sm:$0xff] }
0x1525   :  { %v975_v15 = vpop.permute.xlu1 %974 }
0x1526   :  { %v977_v16 = vadd.f32 %v975_v15, %v967_v14 }
0x1528   :  { %1604 = vtanh.f32 %v977_v16  ;;  %v993_v17 = vsel %vm991_vm4, %v977_v16, %v888_v13 }
0x1532   :  { %v1605_v22 = vpop.eup %1604 }
0x1533   :  { %980 = vrot.lane.b32.xlu1 %v1605_v22, %s1633_s4 }
0x1537   :  { %366 = vrot.lane.b32.xlu1 %v364_v31, %s1634_s12 }
0x153b   :  { %576 = vrot.lane.b32.xlu1 %v574_v33, %s1634_s12 }
0x153f   :  { %786 = vrot.lane.b32.xlu1 %v784_v35, %s1634_s12 }
0x15a5   :  { %v981_v36 = vpop.permute.xlu1 %980 }
0x15a6   :  { %v983_v37 = vmul.f32 %v1603_v11, %v981_v36 }
0x15a8   :  { %v994_v20 = vsel %vm991_vm4, %v983_v37, 0.0  ;;  %v992_v23 = vsel %vm991_vm4, %v983_v37, %v1945_v63 }
0x15a9   :  { %996 = vrot.lane.b32.xlu1 %v994_v20, %s1634_s12  ;;  %1001 = vrot.lane.b32.xlu0 %v992_v23, %s1634_s12  ;;  %v367_v19 = vpop.permute.xlu1 %366 }
0x15aa   :  { %369 = vst.msk [vmem:[#allocation3 + $0x8] sm:$0xff] %vm38_vm2, %v367_v19 }
0x15ad   :  { %1006 = vrot.lane.b32.xlu1 %v993_v17, %s1635_s23  ;;  %v577_v38 = vpop.permute.xlu1 %576 }
0x15ae   :  { %579 = vst.msk [vmem:[#allocation3 + $0x18] sm:$0xff] %vm38_vm2, %v577_v38 }
0x15b1   :  { %v787_v40 = vpop.permute.xlu1 %786  ;;  %v1011_v43 = vld [vmem:[#allocation3 + $0x8] sm:$0xff] }
0x15b2   :  { %789 = vst.msk [vmem:[#allocation3 + $0x28] sm:$0xff] %vm38_vm2, %v787_v40  ;;  %v1018_v44 = vpack.c.bf16 %v1011_v43, %v1010_v42 }
0x15b4   :  { %1472 = vmatprep.mubr.msk.bf16.mxu0 %vm38_vm2, %v1018_v44 }
0x15b5   :  { %v1013_v30 = vld [vmem:[#allocation3 + $0x18] sm:$0xff] }
0x15b6   :  { %v1019_v28 = vpack.c.bf16 %v1013_v30, %v1012_v46 }
0x15b8   :  { %1473 = vmatmul.mubr.msk.bf16.vlgmr.msra.gmra.mrb[28].mxu0 %vm38_vm2, %v1019_v28 }
0x15b9   :  { %v1015_v49 = vld [vmem:[#allocation3 + $0x28] sm:$0xff] }
0x15ba   :  { %v1020_v50 = vpack.c.bf16 %v1015_v49, %v1014_v21 }
0x15bc   :  { %1476 = vmatprep.mubr.msk.bf16.mxu0 %vm38_vm2, %v1020_v50 }
0x161b   :  { %v1002_v53 = vpop.permute.xlu0 %1001  ;;  %v997_v55 = vpop.permute.xlu1 %996 }
0x161c   :  { %1004 = vst.msk [vmem:[#allocation4] sm:$0xff] %vm38_vm2, %v1002_v53  ;;  %999 = vst.msk [vmem:[#allocation3 + $0x38] sm:$0xff] %vm38_vm2, %v997_v55 }
0x161f   :  { %v1007_v60 = vpop.permute.xlu1 %1006 }
0x1620   :  { %1009 = vst.msk [vmem:[#allocation5] sm:$0xff] %vm38_vm2, %v1007_v60 }
0x1623   :  { %v1017_v63 = vld [vmem:[#allocation3 + $0x38] sm:$0xff] }
0x1624   :  { %v1021_v0 = vpack.c.bf16 %v1017_v63, %v1016_v61 }
0x1626   :  { %1477 = vmatmul.mubr.msk.bf16.gmra.mrb[32].mxu0 %vm38_vm2, %v1021_v0 }
0x168b   :  { %v1474_v1 = vpop.f32.mrb[28].mxu0 }
0x168c   :  { %v1091_v2 = vpop.f32.mrb[29].mxu0  ;;  %v1100_v4 = vadd.f32 %v1474_v1, %v1331_v10 }
0x168d   :  { %v1475_v3 = vpop.f32.mrb[30].mxu0  ;;  %v1092_v7 = vadd.f32 %v1331_v10, %v1091_v2 }
0x168e   :  { %v1103_v5 = vadd.f32 %v1475_v3, %v1331_v10  ;;  %v1094_v6 = vpop.f32.mrb[31].mxu0 }
0x168f   :  { %v1095_v8 = vadd.f32 %v1331_v10, %v1094_v6 }
0x1690   :  { %v1123_v32 = vpack.c.bf16 %v1103_v5, %v1100_v4 }
0x1691   :  { %v1122_v47 = vpack.c.bf16 %v1095_v8, %v1092_v7 }
0x1693   :  { %1496 = vmatprep.mubr.bf16.mxu1 %v1122_v47 }
0x1694   :  { %1497 = vmatmul.mubr.bf16.vlgmr.msra.gmra.mrb[12].mxu1 %v1123_v32 }
0x16f9   :  { %v1478_v41 = vpop.f32.mrb[32].mxu0 }
0x16fa   :  { %v1107_v59 = vpop.f32.mrb[33].mxu0  ;;  %v1116_v9 = vadd.f32 %v1478_v41, %v1331_v10 }
0x16fb   :  { %v1479_v62 = vpop.f32.mrb[34].mxu0  ;;  %v1108_v58 = vadd.f32 %v1331_v10, %v1107_v59 }
0x16fc   :  { %v1119_v11 = vadd.f32 %v1479_v62, %v1331_v10  ;;  %v1110_v56 = vpop.f32.mrb[35].mxu0 }
0x16fd   :  { %v1111_v12 = vadd.f32 %v1331_v10, %v1110_v56 }
0x16fe   :  { %v1125_v34 = vpack.c.bf16 %v1119_v11, %v1116_v9 }
0x16ff   :  { %v1124_v54 = vpack.c.bf16 %v1111_v12, %v1108_v58 }
0x1701   :  { %1500 = vmatprep.mubr.bf16.mxu1 %v1124_v54 }
0x1702   :  { %1501 = vmatmul.mubr.bf16.gmra.mrb[16].mxu1 %v1125_v34 }
0x1767   :  { %v1498_v24 = vpop.f32.mrb[12].mxu1 }
0x1768   :  { %v1240_v13 = vadd.f32 %v1498_v24, %v1338_v57  ;;  %v1231_v14 = vpop.f32.mrb[13].mxu1 }
0x1769   :  { %v1232_v15 = vadd.f32 %v1338_v57, %v1231_v14  ;;  %v1499_v16 = vpop.f32.mrb[14].mxu1 }
0x176a   :  { %1264 = vst [vmem:[#allocation6 + $0x10] sm:$0xff] %v1240_v13  ;;  %v1243_v17 = vadd.f32 %v1499_v16, %v1338_v57  ;;  %v1234_v18 = vpop.f32.mrb[15].mxu1 }
0x176b   :  { %1262 = vst [vmem:[#allocation6] sm:$0xff] %v1232_v15  ;;  %v1235_v22 = vadd.f32 %v1338_v57, %v1234_v18 }
0x176c   :  { %1265 = vst [vmem:[#allocation6 + $0x18] sm:$0xff] %v1243_v17 }
0x176d   :  { %1263 = vst [vmem:[#allocation6 + $0x8] sm:$0xff] %v1235_v22 }
0x17d5   :  { %v1502_v29 = vpop.f32.mrb[16].mxu1 }
0x17d6   :  { %v1256_v31 = vadd.f32 %v1502_v29, %v1338_v57  ;;  %v1247_v33 = vpop.f32.mrb[17].mxu1 }
0x17d7   :  { %v1248_v35 = vadd.f32 %v1338_v57, %v1247_v33  ;;  %v1503_v36 = vpop.f32.mrb[18].mxu1 }
0x17d8   :  { %1268 = vst [vmem:[#allocation6 + $0x30] sm:$0xff] %v1256_v31  ;;  %v1259_v37 = vadd.f32 %v1503_v36, %v1338_v57  ;;  %v1250_v25 = vpop.f32.mrb[19].mxu1 }
0x17d9   :  { %1266 = vst [vmem:[#allocation6 + $0x20] sm:$0xff] %v1248_v35  ;;  %v1251_v27 = vadd.f32 %v1338_v57, %v1250_v25 }
0x17da   :  { %1269 = vst [vmem:[#allocation6 + $0x38] sm:$0xff] %v1259_v37 }
0x17db   :  { %1267 = vst [vmem:[#allocation6 + $0x28] sm:$0xff] %v1251_v27 }
0x17dc   :  { %1617 = shalt.err (!%p1614_p4)
}
0x17dd   :  { %s1618_s3 = scalar_lea.hbm %s2061_s9, 1024 }
0x17de   :  { %p1619_p5 = scmp.ne.s32.totalorder %s2061_s9, %s1618_s3  ;;  %p1622_p6 = scmp.lt.u32.totalorder %s1618_s3, %s2061_s9 }
0x17e0   :  { %p1624_p7 = pnand %p1622_p6, %p1619_p5 }
0x17e2   :  { %1627 = shalt.err (!%p1624_p7)
}
0x17e3   :  { %s1637_s4 = smov 128   ;;  %s1638_s19 = smov 8  }
0x17e4   :  { %1281 = dma.vmem_to_hbm [thread:$0]  %s1276_s14, 1024, %s2061_s9, [#allocation7], %s1637_s4, %s1637_s4, %s1638_s19  }
0x17e5   :  { %1628 = dma.done.wait [#allocation7], 1024  }
0x17e6   :  { %1629 = vsyncadd [#allocation7], 4294966272 }
0x17e7   :  { %1285 = vsyncpa [#allocation7], 1 }

</bundles_post_ra>
